<compile_context>
chip_gen: v6e
topology: v6e:2x2x1
jax: 0.10.0
libtpu: 0.0.40
codegen_flags: <defaults>
</compile_context>

<pallas_src>
import numpy as np
import jax
import jax.numpy as jnp
from jax import lax
from jax.experimental import pallas as pl
from jax.experimental.pallas import tpu as pltpu


# ----------------------------------------------------------------------------
# Static geometry
# ----------------------------------------------------------------------------
def _geom(m):
    """Geometry for an encoder whose (un-padded) input length is m."""
    l1 = m + 1                # Conv1d(k=8, pad=4, stride=1) output length
    l2 = l1 // 2              # MaxPool1d(2, 2) output length
    l3 = l2 + 1               # second Conv1d output length
    p = m + 8 + (m % 2)       # even per-batch padded stride (>= m+8 and >= 2*l2+8)
    pe = p // 2               # per-batch stride of the even/odd de-interleaved input
    p2 = l2 + 8               # per-batch stride of the re-padded pooled signal
    return l1, l2, l3, p, pe, p2


# ----------------------------------------------------------------------------
# Shared in-kernel encoder body (values; whole batch at once)
# ----------------------------------------------------------------------------
def _encode(xe, xo, w1t, b1, w2t, b2, avgt, wpt, bp, *, batch, pe, l2):
    """xe/xo: (batch*pe, C) even/odd de-interleaved, per-batch zero-padded input.

    Returns lane-dense h (batch, 64) and z (batch, D).
    """
    c = xe.shape[1]
    w = batch * pe - 4                      # packed conv1/pool width (junk past l2)

    # --- Conv1d(C->32, k=8, pad=4) fused with MaxPool1d(2,2): im2col slabs for the
    #     even and odd output positions, one MXU matmul, VPU max. ---
    cols_e, cols_o = [], []
    for k in range(8):
        m = k // 2
        if k % 2 == 0:
            cols_e.append(xe[m:m + w, :])
            cols_o.append(xo[m:m + w, :])
        else:
            cols_e.append(xo[m:m + w, :])
            cols_o.append(xe[m + 1:m + 1 + w, :])
    slab_e = jnp.concatenate(cols_e, axis=1)            # (w, C*8)
    slab_o = jnp.concatenate(cols_o, axis=1)            # (w, C*8)
    slab1 = jnp.concatenate([slab_e, slab_o], axis=0)   # (2w, C*8)
    h1 = jnp.dot(slab1, w1t, preferred_element_type=jnp.float32)   # (2w, 32)
    pooled = jnp.maximum(jnp.maximum(h1[:w, :], h1[w:, :]) + b1, 0.0)   # (w, 32)

    # --- re-pad the valid pooled columns (4 zeros each side) for conv2 ---
    p2 = l2 + 8
    zpad = jnp.zeros((4, 32), jnp.float32)
    blocks = []
    for b in range(batch):
        blocks += [zpad, pooled[b * pe:b * pe + l2, :], zpad]
    pp = jnp.concatenate(blocks, axis=0)                 # (batch*p2, 32)

    # --- Conv1d(32->64, k=8, pad=4): single K=256 matmul over the whole batch ---
    w2cols = batch * p2 - 7
    slab2 = jnp.concatenate([pp[k:k + w2cols, :] for k in range(8)], axis=1)  # (w2cols, 256)
    h2 = jnp.maximum(jnp.dot(slab2, w2t, preferred_element_type=jnp.float32) + b2, 0.0)

    # --- AdaptiveAvgPool1d(1) as a masked-mean matmul, then Linear(64 -> D) ---
    hfeat = jnp.dot(avgt, h2, preferred_element_type=jnp.float32)   # (batch, 64)
    z = jnp.dot(hfeat, wpt, preferred_element_type=jnp.float32) + bp  # (batch, D)
    return hfeat, z


# ----------------------------------------------------------------------------
# Host-built constants
# ----------------------------------------------------------------------------
def _make_dft(L, pe):
    """(4*pe, L) rows = [cos_even; cos_odd; sin_even; sin_odd] of the zero-padded DFT."""
    lf = L // 2 + 1
    p = 2 * pe
    t = np.arange(L)[:, None].astype(np.float64)
    f = np.arange(lf)[None, :].astype(np.float64)
    ang = 2.0 * np.pi * t * f / L
    cos_full = np.zeros((L, p), np.float64)
    sin_full = np.zeros((L, p), np.float64)
    cos_full[:, 4:4 + lf] = np.cos(ang)
    sin_full[:, 4:4 + lf] = -np.sin(ang)
    ct, st = cos_full.T, sin_full.T
    return jnp.asarray(np.concatenate([ct[0::2], ct[1::2], st[0::2], st[1::2]],
                                      axis=0).astype(np.float32))


def _make_avg(batch, p2, l3, w2cols):
    """(batch, w2cols) masked-mean matrix for AdaptiveAvgPool1d(1)."""
    a = np.zeros((batch, w2cols), np.float32)
    for b in range(batch):
        a[b, b * p2:b * p2 + l3] = 1.0 / l3
    return jnp.asarray(a)


# ----------------------------------------------------------------------------
# Parameters (matches the PyTorch module's layers)
# ----------------------------------------------------------------------------
def init_params(key, in_channels, out_dim):
    keys = jax.random.split(key, 12)
    f32 = jnp.float32

    def conv_w(k, o, i, ksz):
        s = 1.0 / np.sqrt(i * ksz)
        return jax.random.uniform(k, (o, i, ksz), f32, -s, s)

    def lin_w(k, o, i):
        s = 1.0 / np.sqrt(i)
        return jax.random.uniform(k, (o, i), f32, -s, s)

    p = {}
    for idx, pref in enumerate(("t", "f")):
        b = idx * 6
        p[pref + "_w1"] = conv_w(keys[b + 0], 32, in_channels, 8)
        p[pref + "_b1"] = jax.random.uniform(keys[b + 1], (32,), f32, -0.1, 0.1)
        p[pref + "_w2"] = conv_w(keys[b + 2], 64, 32, 8)
        p[pref + "_b2"] = jax.random.uniform(keys[b + 3], (64,), f32, -0.1, 0.1)
        p[pref + "_wp"] = lin_w(keys[b + 4], out_dim, 64)
        p[pref + "_bp"] = jax.random.uniform(keys[b + 5], (out_dim,), f32, -0.1, 0.1)
    return p


# ----------------------------------------------------------------------------
# Forward pass: one fused pallas_call
# ----------------------------------------------------------------------------
def tfc_forward(x, params):
    """x: (B, L, C) float32. Returns (h_time, h_freq, z_time, z_freq)."""
    B, L, C = x.shape
    D = params["t_wp"].shape[0]
    f32 = jnp.float32

    _, l2_t, l3_t, p_t, pe_t, p2_t = _geom(L)
    lf = L // 2 + 1
    _, l2_f, l3_f, _, pe_f, p2_f = _geom(lf)
    w2cols_t = B * p2_t - 7
    w2cols_f = B * p2_f - 7

    # ---- host-side layout prep (pure layout, no compute) ----
    xpad = jnp.pad(x.astype(f32), ((0, 0), (4, p_t - 4 - L), (0, 0)))  # (B, P, C)
    xpad = xpad.reshape(B * p_t, C)
    xe_t = xpad[0::2, :]                                  # (B*pe_t, C) even time steps
    xo_t = xpad[1::2, :]                                  # (B*pe_t, C) odd time steps
    xcat = jnp.transpose(x.astype(f32), (1, 0, 2)).reshape(L, B * C)   # (L, B*C)

    # ---- host-built constants ----
    dftt = _make_dft(L, pe_f)                             # (4*pe_f, L)
    avgt_t = _make_avg(B, p2_t, l3_t, w2cols_t)           # (B, w2cols_t)
    avgt_f = _make_avg(B, p2_f, l3_f, w2cols_f)           # (B, w2cols_f)

    # ---- weights: fold the 8 conv taps, stack [time, freq] on a branch axis ----
    def prep(prefix):
        w1t = jnp.transpose(params[prefix + "_w1"], (2, 1, 0)).reshape(8 * C, 32)
        b1 = params[prefix + "_b1"].reshape(1, 32)
        w2t = jnp.transpose(params[prefix + "_w2"], (2, 1, 0)).reshape(256, 64)
        b2 = params[prefix + "_b2"].reshape(1, 64)
        wpt = params[prefix + "_wp"].T                    # (64, D)
        bp = params[prefix + "_bp"].reshape(1, D)
        return [a.astype(f32) for a in (w1t, b1, w2t, b2, wpt, bp)]

    stacked = [jnp.stack([wt, wf], axis=0) for wt, wf in zip(prep("t"), prep("f"))]

    # ---- kernel ----
    def kernel(w1t_ref, b1_ref, w2t_ref, b2_ref, wpt_ref, bp_ref,
               xe_t_ref, xo_t_ref, xcat_ref, dftt_ref, avgt_t_ref, avgt_f_ref,
               h_ref, z_ref):
        branch = pl.program_id(0)
        w1t = w1t_ref[0]
        b1 = b1_ref[0]
        w2t = w2t_ref[0]
        b2 = b2_ref[0]
        wpt = wpt_ref[0]
        bp = bp_ref[0]

        @pl.when(branch == 0)
        def _time_branch():
            h, z = _encode(xe_t_ref[...], xo_t_ref[...], w1t, b1, w2t, b2,
                           avgt_t_ref[...], wpt, bp, batch=B, pe=pe_t, l2=l2_t)
            h_ref[0] = h
            z_ref[0] = z

        @pl.when(branch == 1)
        def _freq_branch():
            # |rfft| as one batched DFT matmul; zero-pad columns are zero rows of dftt.
            proj = jnp.dot(dftt_ref[...], xcat_ref[...],
                           preferred_element_type=jnp.float32)        # (4*pe_f, B*C)
            re_e = proj[0 * pe_f:1 * pe_f, :]
            re_o = proj[1 * pe_f:2 * pe_f, :]
            im_e = proj[2 * pe_f:3 * pe_f, :]
            im_o = proj[3 * pe_f:4 * pe_f, :]
            mag_e = jnp.sqrt(re_e * re_e + im_e * im_e)                # (pe_f, B*C)
            mag_o = jnp.sqrt(re_o * re_o + im_o * im_o)
            # (pe_f, B*C) -> (B*pe_f, C)
            xe_f = jnp.concatenate([mag_e[:, b * C:(b + 1) * C] for b in range(B)], axis=0)
            xo_f = jnp.concatenate([mag_o[:, b * C:(b + 1) * C] for b in range(B)], axis=0)
            h, z = _encode(xe_f, xo_f, w1t, b1, w2t, b2,
                           avgt_f_ref[...], wpt, bp, batch=B, pe=pe_f, l2=l2_f)
            h_ref[0] = h
            z_ref[0] = z

    # ---- specs ----
    def branch_spec(shape):
        nd = len(shape)
        return pl.BlockSpec((1,) + tuple(shape[1:]),
                            lambda i, nd=nd: (i,) + (0,) * (nd - 1))

    def full_spec(shape):
        nd = len(shape)
        return pl.BlockSpec(tuple(shape), lambda i, nd=nd: (0,) * nd)

    data = [xe_t, xo_t, xcat, dftt, avgt_t, avgt_f]
    in_specs = [branch_spec(a.shape) for a in stacked] + [full_spec(a.shape) for a in data]

    h_all, z_all = pl.pallas_call(
        kernel,
        grid=(2,),
        in_specs=in_specs,
        out_specs=(pl.BlockSpec((1, B, 64), lambda i: (i, 0, 0)),
                   pl.BlockSpec((1, B, D), lambda i: (i, 0, 0))),
        out_shape=(jax.ShapeDtypeStruct((2, B, 64), f32),
                   jax.ShapeDtypeStruct((2, B, D), f32)),
        compiler_params=pltpu.CompilerParams(dimension_semantics=("parallel",)),
    )(*stacked, *data)

    return h_all[0], h_all[1], z_all[0], z_all[1]


# ----------------------------------------------------------------------------
# Pure-JAX reference (mirrors the PyTorch forward) for validation
# ----------------------------------------------------------------------------
def _encoder_ref(xc, w1, b1, w2, b2):
    dn = ("NCH", "OIH", "NCH")
    y = lax.conv_general_dilated(xc, w1, (1,), [(4, 4)], dimension_numbers=dn)
    y = jax.nn.relu(y + b1[None, :, None])
    y = lax.reduce_window(y, -jnp.inf, lax.max, (1, 1, 2), (1, 1, 2), "VALID")
    y = lax.conv_general_dilated(y, w2, (1,), [(4, 4)], dimension_numbers=dn)
    y = jax.nn.relu(y + b2[None, :, None])
    return jnp.mean(y, axis=-1)


def reference_forward(x, p):
    x_time = jnp.transpose(x, (0, 2, 1))
    h_time = _encoder_ref(x_time, p["t_w1"], p["t_b1"], p["t_w2"], p["t_b2"])
    z_time = h_time @ p["t_wp"].T + p["t_bp"]
    x_freq = jnp.transpose(jnp.abs(jnp.fft.rfft(x, axis=1)), (0, 2, 1))
    h_freq = _encoder_ref(x_freq, p["f_w1"], p["f_b1"], p["f_w2"], p["f_b2"])
    z_freq = h_freq @ p["f_wp"].T + p["f_bp"]
    return h_time, h_freq, z_time, z_freq


if __name__ == "__main__":
    B, L, C, D = 2, 16, 9, 64            # batch, seq_len, input_channels, output_dim
    key = jax.random.PRNGKey(0)
    kx, kp = jax.random.split(key)
    x = jax.random.normal(kx, (B, L, C), jnp.float32)
    params = init_params(kp, C, D)

    outs = jax.block_until_ready(jax.jit(tfc_forward)(x, params))
    refs = reference_forward(x, params)
    for got, ref in zip(outs, refs):
        np.testing.assert_allclose(np.asarray(got), np.asarray(ref),
                                   rtol=5e-3, atol=5e-3)
    print("KERNEL_OK")
</pallas_src>

<mosaic_0001>
module attributes {stable_mosaic.version = 11 : i64} {
  func.func @kernel(%arg0: i32, %arg1: memref<1x72x32xf32, #tpu.memory_space<vmem>>, %arg2: memref<1x1x32xf32, #tpu.memory_space<vmem>>, %arg3: memref<1x256x64xf32, #tpu.memory_space<vmem>>, %arg4: memref<1x1x64xf32, #tpu.memory_space<vmem>>, %arg5: memref<1x64x64xf32, #tpu.memory_space<vmem>>, %arg6: memref<1x1x64xf32, #tpu.memory_space<vmem>>, %arg7: memref<24x9xf32, #tpu.memory_space<vmem>>, %arg8: memref<24x9xf32, #tpu.memory_space<vmem>>, %arg9: memref<16x18xf32, #tpu.memory_space<vmem>>, %arg10: memref<36x16xf32, #tpu.memory_space<vmem>>, %arg11: memref<2x25xf32, #tpu.memory_space<vmem>>, %arg12: memref<2x19xf32, #tpu.memory_space<vmem>>, %arg13: memref<1x2x64xf32, #tpu.memory_space<vmem>>, %arg14: memref<1x2x64xf32, #tpu.memory_space<vmem>>) attributes {dimension_semantics = [#tpu.dimension_semantics<parallel>], iteration_bounds = array<i64: 2>, scalar_prefetch = 0 : i64, scratch_operands = 0 : i64, tpu.core_type = #tpu.core_type<tc>, window_params = [{transform_indices = @transform_0, window_bounds = array<i64: 1, 72, 32>}, {transform_indices = @transform_1, window_bounds = array<i64: 1, 1, 32>}, {transform_indices = @transform_2, window_bounds = array<i64: 1, 256, 64>}, {transform_indices = @transform_3, window_bounds = array<i64: 1, 1, 64>}, {transform_indices = @transform_4, window_bounds = array<i64: 1, 64, 64>}, {transform_indices = @transform_5, window_bounds = array<i64: 1, 1, 64>}, {pipeline_mode = #tpu.pipeline_mode<synchronous>, transform_indices = @transform_6, window_bounds = array<i64: 24, 9>}, {pipeline_mode = #tpu.pipeline_mode<synchronous>, transform_indices = @transform_7, window_bounds = array<i64: 24, 9>}, {pipeline_mode = #tpu.pipeline_mode<synchronous>, transform_indices = @transform_8, window_bounds = array<i64: 16, 18>}, {pipeline_mode = #tpu.pipeline_mode<synchronous>, transform_indices = @transform_9, window_bounds = array<i64: 36, 16>}, {pipeline_mode = #tpu.pipeline_mode<synchronous>, transform_indices = @transform_10, window_bounds = array<i64: 2, 25>}, {pipeline_mode = #tpu.pipeline_mode<synchronous>, transform_indices = @transform_11, window_bounds = array<i64: 2, 19>}, {transform_indices = @transform_12, window_bounds = array<i64: 1, 2, 64>}, {transform_indices = @transform_13, window_bounds = array<i64: 1, 2, 64>}]} {
    %c0 = arith.constant 0 : index
    %c0_0 = arith.constant 0 : index
    %c0_1 = arith.constant 0 : index
    %0 = vector.load %arg1[%c0, %c0_0, %c0_1] : memref<1x72x32xf32, #tpu.memory_space<vmem>>, vector<1x72x32xf32>
    %1 = vector.shape_cast %0 : vector<1x72x32xf32> to vector<72x32xf32>
    %c0_2 = arith.constant 0 : index
    %c0_3 = arith.constant 0 : index
    %c0_4 = arith.constant 0 : index
    %2 = vector.load %arg2[%c0_2, %c0_3, %c0_4] : memref<1x1x32xf32, #tpu.memory_space<vmem>>, vector<1x1x32xf32>
    %3 = vector.shape_cast %2 : vector<1x1x32xf32> to vector<1x32xf32>
    %c0_5 = arith.constant 0 : index
    %c0_6 = arith.constant 0 : index
    %c0_7 = arith.constant 0 : index
    %4 = vector.load %arg3[%c0_5, %c0_6, %c0_7] : memref<1x256x64xf32, #tpu.memory_space<vmem>>, vector<1x256x64xf32>
    %5 = vector.shape_cast %4 : vector<1x256x64xf32> to vector<256x64xf32>
    %c0_8 = arith.constant 0 : index
    %c0_9 = arith.constant 0 : index
    %c0_10 = arith.constant 0 : index
    %6 = vector.load %arg4[%c0_8, %c0_9, %c0_10] : memref<1x1x64xf32, #tpu.memory_space<vmem>>, vector<1x1x64xf32>
    %7 = vector.shape_cast %6 : vector<1x1x64xf32> to vector<1x64xf32>
    %c0_11 = arith.constant 0 : index
    %c0_12 = arith.constant 0 : index
    %c0_13 = arith.constant 0 : index
    %8 = vector.load %arg5[%c0_11, %c0_12, %c0_13] : memref<1x64x64xf32, #tpu.memory_space<vmem>>, vector<1x64x64xf32>
    %9 = vector.shape_cast %8 : vector<1x64x64xf32> to vector<64x64xf32>
    %c0_14 = arith.constant 0 : index
    %c0_15 = arith.constant 0 : index
    %c0_16 = arith.constant 0 : index
    %10 = vector.load %arg6[%c0_14, %c0_15, %c0_16] : memref<1x1x64xf32, #tpu.memory_space<vmem>>, vector<1x1x64xf32>
    %11 = vector.shape_cast %10 : vector<1x1x64xf32> to vector<1x64xf32>
    %c0_i32 = arith.constant 0 : i32
    %12 = arith.cmpi eq, %arg0, %c0_i32 : i32
    %13 = arith.extui %12 : i1 to i32
    %c0_i32_17 = arith.constant 0 : i32
    %14 = arith.cmpi ne, %13, %c0_i32_17 : i32
    scf.if %14 {
      %c0_19 = arith.constant 0 : index
      %c0_20 = arith.constant 0 : index
      %18 = vector.load %arg7[%c0_19, %c0_20] : memref<24x9xf32, #tpu.memory_space<vmem>>, vector<24x9xf32>
      %c0_21 = arith.constant 0 : index
      %c0_22 = arith.constant 0 : index
      %19 = vector.load %arg8[%c0_21, %c0_22] : memref<24x9xf32, #tpu.memory_space<vmem>>, vector<24x9xf32>
      %c0_23 = arith.constant 0 : index
      %c0_24 = arith.constant 0 : index
      %20 = vector.load %arg11[%c0_23, %c0_24] : memref<2x25xf32, #tpu.memory_space<vmem>>, vector<2x25xf32>
      %21 = vector.extract_strided_slice %18 {offsets = [0, 0], sizes = [20, 9], strides = [1, 1]} : vector<24x9xf32> to vector<20x9xf32>
      %22 = vector.extract_strided_slice %19 {offsets = [0, 0], sizes = [20, 9], strides = [1, 1]} : vector<24x9xf32> to vector<20x9xf32>
      %23 = vector.extract_strided_slice %19 {offsets = [0, 0], sizes = [20, 9], strides = [1, 1]} : vector<24x9xf32> to vector<20x9xf32>
      %24 = vector.extract_strided_slice %18 {offsets = [1, 0], sizes = [20, 9], strides = [1, 1]} : vector<24x9xf32> to vector<20x9xf32>
      %25 = vector.extract_strided_slice %18 {offsets = [1, 0], sizes = [20, 9], strides = [1, 1]} : vector<24x9xf32> to vector<20x9xf32>
      %26 = vector.extract_strided_slice %19 {offsets = [1, 0], sizes = [20, 9], strides = [1, 1]} : vector<24x9xf32> to vector<20x9xf32>
      %27 = vector.extract_strided_slice %19 {offsets = [1, 0], sizes = [20, 9], strides = [1, 1]} : vector<24x9xf32> to vector<20x9xf32>
      %28 = vector.extract_strided_slice %18 {offsets = [2, 0], sizes = [20, 9], strides = [1, 1]} : vector<24x9xf32> to vector<20x9xf32>
      %29 = vector.extract_strided_slice %18 {offsets = [2, 0], sizes = [20, 9], strides = [1, 1]} : vector<24x9xf32> to vector<20x9xf32>
      %30 = vector.extract_strided_slice %19 {offsets = [2, 0], sizes = [20, 9], strides = [1, 1]} : vector<24x9xf32> to vector<20x9xf32>
      %31 = vector.extract_strided_slice %19 {offsets = [2, 0], sizes = [20, 9], strides = [1, 1]} : vector<24x9xf32> to vector<20x9xf32>
      %32 = vector.extract_strided_slice %18 {offsets = [3, 0], sizes = [20, 9], strides = [1, 1]} : vector<24x9xf32> to vector<20x9xf32>
      %33 = vector.extract_strided_slice %18 {offsets = [3, 0], sizes = [20, 9], strides = [1, 1]} : vector<24x9xf32> to vector<20x9xf32>
      %34 = vector.extract_strided_slice %19 {offsets = [3, 0], sizes = [20, 9], strides = [1, 1]} : vector<24x9xf32> to vector<20x9xf32>
      %35 = vector.extract_strided_slice %19 {offsets = [3, 0], sizes = [20, 9], strides = [1, 1]} : vector<24x9xf32> to vector<20x9xf32>
      %36 = vector.extract_strided_slice %18 {offsets = [4, 0], sizes = [20, 9], strides = [1, 1]} : vector<24x9xf32> to vector<20x9xf32>
      %37 = tpu.concatenate %21, %23, %25, %27, %29, %31, %33, %35 in 1 : vector<20x9xf32>, vector<20x9xf32>, vector<20x9xf32>, vector<20x9xf32>, vector<20x9xf32>, vector<20x9xf32>, vector<20x9xf32>, vector<20x9xf32> -> vector<20x72xf32>
      %38 = tpu.concatenate %22, %24, %26, %28, %30, %32, %34, %36 in 1 : vector<20x9xf32>, vector<20x9xf32>, vector<20x9xf32>, vector<20x9xf32>, vector<20x9xf32>, vector<20x9xf32>, vector<20x9xf32>, vector<20x9xf32> -> vector<20x72xf32>
      %39 = tpu.concatenate %37, %38 in 0 : vector<20x72xf32>, vector<20x72xf32> -> vector<40x72xf32>
      %cst = arith.constant dense<0.000000e+00> : vector<40x32xf32>
      %40 = tpu.matmul %39, %1, %cst {dimension_numbers = #tpu.dot_dimension_numbers<[1], [0], [0], [1], [0, 0, 1, 1], [], []>} : vector<40x72xf32>, vector<72x32xf32>, vector<40x32xf32> -> vector<40x32xf32>
      %41 = vector.extract_strided_slice %40 {offsets = [0, 0], sizes = [20, 32], strides = [1, 1]} : vector<40x32xf32> to vector<20x32xf32>
      %42 = vector.extract_strided_slice %40 {offsets = [20, 0], sizes = [20, 32], strides = [1, 1]} : vector<40x32xf32> to vector<20x32xf32>
      %43 = arith.maximumf %41, %42 : vector<20x32xf32>
      %44 = vector.broadcast %3 : vector<1x32xf32> to vector<20x32xf32>
      %45 = arith.addf %43, %44 : vector<20x32xf32>
      %cst_25 = arith.constant 0.000000e+00 : f32
      %46 = vector.broadcast %cst_25 : f32 to vector<20x32xf32>
      %47 = arith.maximumf %45, %46 : vector<20x32xf32>
      %cst_26 = arith.constant 0.000000e+00 : f32
      %48 = vector.broadcast %cst_26 : f32 to vector<4x32xf32>
      %49 = vector.extract_strided_slice %47 {offsets = [0, 0], sizes = [8, 32], strides = [1, 1]} : vector<20x32xf32> to vector<8x32xf32>
      %50 = vector.extract_strided_slice %47 {offsets = [12, 0], sizes = [8, 32], strides = [1, 1]} : vector<20x32xf32> to vector<8x32xf32>
      %51 = tpu.concatenate %48, %49, %48, %48, %50, %48 in 0 : vector<4x32xf32>, vector<8x32xf32>, vector<4x32xf32>, vector<4x32xf32>, vector<8x32xf32>, vector<4x32xf32> -> vector<32x32xf32>
      %52 = vector.extract_strided_slice %51 {offsets = [0, 0], sizes = [25, 32], strides = [1, 1]} : vector<32x32xf32> to vector<25x32xf32>
      %53 = vector.extract_strided_slice %51 {offsets = [1, 0], sizes = [25, 32], strides = [1, 1]} : vector<32x32xf32> to vector<25x32xf32>
      %54 = vector.extract_strided_slice %51 {offsets = [2, 0], sizes = [25, 32], strides = [1, 1]} : vector<32x32xf32> to vector<25x32xf32>
      %55 = vector.extract_strided_slice %51 {offsets = [3, 0], sizes = [25, 32], strides = [1, 1]} : vector<32x32xf32> to vector<25x32xf32>
      %56 = vector.extract_strided_slice %51 {offsets = [4, 0], sizes = [25, 32], strides = [1, 1]} : vector<32x32xf32> to vector<25x32xf32>
      %57 = vector.extract_strided_slice %51 {offsets = [5, 0], sizes = [25, 32], strides = [1, 1]} : vector<32x32xf32> to vector<25x32xf32>
      %58 = vector.extract_strided_slice %51 {offsets = [6, 0], sizes = [25, 32], strides = [1, 1]} : vector<32x32xf32> to vector<25x32xf32>
      %59 = vector.extract_strided_slice %51 {offsets = [7, 0], sizes = [25, 32], strides = [1, 1]} : vector<32x32xf32> to vector<25x32xf32>
      %60 = tpu.concatenate %52, %53, %54, %55, %56, %57, %58, %59 in 1 : vector<25x32xf32>, vector<25x32xf32>, vector<25x32xf32>, vector<25x32xf32>, vector<25x32xf32>, vector<25x32xf32>, vector<25x32xf32>, vector<25x32xf32> -> vector<25x256xf32>
      %cst_27 = arith.constant dense<0.000000e+00> : vector<25x64xf32>
      %61 = tpu.matmul %60, %5, %cst_27 {dimension_numbers = #tpu.dot_dimension_numbers<[1], [0], [0], [1], [0, 0, 1, 1], [], []>} : vector<25x256xf32>, vector<256x64xf32>, vector<25x64xf32> -> vector<25x64xf32>
      %62 = vector.broadcast %7 : vector<1x64xf32> to vector<25x64xf32>
      %63 = arith.addf %61, %62 : vector<25x64xf32>
      %cst_28 = arith.constant 0.000000e+00 : f32
      %64 = vector.broadcast %cst_28 : f32 to vector<25x64xf32>
      %65 = arith.maximumf %63, %64 : vector<25x64xf32>
      %cst_29 = arith.constant dense<0.000000e+00> : vector<2x64xf32>
      %66 = tpu.matmul %20, %65, %cst_29 {dimension_numbers = #tpu.dot_dimension_numbers<[1], [0], [0], [1], [0, 0, 1, 1], [], []>} : vector<2x25xf32>, vector<25x64xf32>, vector<2x64xf32> -> vector<2x64xf32>
      %cst_30 = arith.constant dense<0.000000e+00> : vector<2x64xf32>
      %67 = tpu.matmul %66, %9, %cst_30 {dimension_numbers = #tpu.dot_dimension_numbers<[1], [0], [0], [1], [0, 0, 1, 1], [], []>} : vector<2x64xf32>, vector<64x64xf32>, vector<2x64xf32> -> vector<2x64xf32>
      %68 = vector.broadcast %11 : vector<1x64xf32> to vector<2x64xf32>
      %69 = arith.addf %67, %68 : vector<2x64xf32>
      %c0_31 = arith.constant 0 : index
      %c0_32 = arith.constant 0 : index
      %c0_33 = arith.constant 0 : index
      %70 = vector.load %arg13[%c0_31, %c0_32, %c0_33] : memref<1x2x64xf32, #tpu.memory_space<vmem>>, vector<1x2x64xf32>
      %71 = vector.shape_cast %70 : vector<1x2x64xf32> to vector<2x64xf32>
      %72 = vector.shape_cast %66 : vector<2x64xf32> to vector<1x2x64xf32>
      tpu.vector_store %arg13[%c0_31, %c0_32, %c0_33], %72 {strides = array<i32>} : memref<1x2x64xf32, #tpu.memory_space<vmem>>, vector<1x2x64xf32>,
      %c0_34 = arith.constant 0 : index
      %c0_35 = arith.constant 0 : index
      %c0_36 = arith.constant 0 : index
      %73 = vector.load %arg14[%c0_34, %c0_35, %c0_36] : memref<1x2x64xf32, #tpu.memory_space<vmem>>, vector<1x2x64xf32>
      %74 = vector.shape_cast %73 : vector<1x2x64xf32> to vector<2x64xf32>
      %75 = vector.shape_cast %69 : vector<2x64xf32> to vector<1x2x64xf32>
      tpu.vector_store %arg14[%c0_34, %c0_35, %c0_36], %75 {strides = array<i32>} : memref<1x2x64xf32, #tpu.memory_space<vmem>>, vector<1x2x64xf32>,
    } else {
    }
    %c1_i32 = arith.constant 1 : i32
    %15 = arith.cmpi eq, %arg0, %c1_i32 : i32
    %16 = arith.extui %15 : i1 to i32
    %c0_i32_18 = arith.constant 0 : i32
    %17 = arith.cmpi ne, %16, %c0_i32_18 : i32
    scf.if %17 {
      %c0_19 = arith.constant 0 : index
      %c0_20 = arith.constant 0 : index
      %18 = vector.load %arg10[%c0_19, %c0_20] : memref<36x16xf32, #tpu.memory_space<vmem>>, vector<36x16xf32>
      %c0_21 = arith.constant 0 : index
      %c0_22 = arith.constant 0 : index
      %19 = vector.load %arg9[%c0_21, %c0_22] : memref<16x18xf32, #tpu.memory_space<vmem>>, vector<16x18xf32>
      %cst = arith.constant dense<0.000000e+00> : vector<36x18xf32>
      %20 = tpu.matmul %18, %19, %cst {dimension_numbers = #tpu.dot_dimension_numbers<[1], [0], [0], [1], [0, 0, 1, 1], [], []>} : vector<36x16xf32>, vector<16x18xf32>, vector<36x18xf32> -> vector<36x18xf32>
      %21 = vector.extract_strided_slice %20 {offsets = [0, 0], sizes = [9, 18], strides = [1, 1]} : vector<36x18xf32> to vector<9x18xf32>
      %22 = vector.extract_strided_slice %20 {offsets = [9, 0], sizes = [9, 18], strides = [1, 1]} : vector<36x18xf32> to vector<9x18xf32>
      %23 = vector.extract_strided_slice %20 {offsets = [18, 0], sizes = [9, 18], strides = [1, 1]} : vector<36x18xf32> to vector<9x18xf32>
      %24 = vector.extract_strided_slice %20 {offsets = [27, 0], sizes = [9, 18], strides = [1, 1]} : vector<36x18xf32> to vector<9x18xf32>
      %25 = arith.mulf %21, %21 : vector<9x18xf32>
      %26 = arith.mulf %23, %23 : vector<9x18xf32>
      %27 = arith.addf %25, %26 : vector<9x18xf32>
      %28 = math.sqrt %27 : vector<9x18xf32>
      %29 = arith.mulf %22, %22 : vector<9x18xf32>
      %30 = arith.mulf %24, %24 : vector<9x18xf32>
      %31 = arith.addf %29, %30 : vector<9x18xf32>
      %32 = math.sqrt %31 : vector<9x18xf32>
      %33 = vector.extract_strided_slice %28 {offsets = [0, 0], sizes = [9, 9], strides = [1, 1]} : vector<9x18xf32> to vector<9x9xf32>
      %34 = vector.extract_strided_slice %28 {offsets = [0, 9], sizes = [9, 9], strides = [1, 1]} : vector<9x18xf32> to vector<9x9xf32>
      %35 = tpu.concatenate %33, %34 in 0 : vector<9x9xf32>, vector<9x9xf32> -> vector<18x9xf32>
      %36 = vector.extract_strided_slice %32 {offsets = [0, 0], sizes = [9, 9], strides = [1, 1]} : vector<9x18xf32> to vector<9x9xf32>
      %37 = vector.extract_strided_slice %32 {offsets = [0, 9], sizes = [9, 9], strides = [1, 1]} : vector<9x18xf32> to vector<9x9xf32>
      %38 = tpu.concatenate %36, %37 in 0 : vector<9x9xf32>, vector<9x9xf32> -> vector<18x9xf32>
      %c0_23 = arith.constant 0 : index
      %c0_24 = arith.constant 0 : index
      %39 = vector.load %arg12[%c0_23, %c0_24] : memref<2x19xf32, #tpu.memory_space<vmem>>, vector<2x19xf32>
      %40 = vector.extract_strided_slice %35 {offsets = [0, 0], sizes = [14, 9], strides = [1, 1]} : vector<18x9xf32> to vector<14x9xf32>
      %41 = vector.extract_strided_slice %38 {offsets = [0, 0], sizes = [14, 9], strides = [1, 1]} : vector<18x9xf32> to vector<14x9xf32>
      %42 = vector.extract_strided_slice %38 {offsets = [0, 0], sizes = [14, 9], strides = [1, 1]} : vector<18x9xf32> to vector<14x9xf32>
      %43 = vector.extract_strided_slice %35 {offsets = [1, 0], sizes = [14, 9], strides = [1, 1]} : vector<18x9xf32> to vector<14x9xf32>
      %44 = vector.extract_strided_slice %35 {offsets = [1, 0], sizes = [14, 9], strides = [1, 1]} : vector<18x9xf32> to vector<14x9xf32>
      %45 = vector.extract_strided_slice %38 {offsets = [1, 0], sizes = [14, 9], strides = [1, 1]} : vector<18x9xf32> to vector<14x9xf32>
      %46 = vector.extract_strided_slice %38 {offsets = [1, 0], sizes = [14, 9], strides = [1, 1]} : vector<18x9xf32> to vector<14x9xf32>
      %47 = vector.extract_strided_slice %35 {offsets = [2, 0], sizes = [14, 9], strides = [1, 1]} : vector<18x9xf32> to vector<14x9xf32>
      %48 = vector.extract_strided_slice %35 {offsets = [2, 0], sizes = [14, 9], strides = [1, 1]} : vector<18x9xf32> to vector<14x9xf32>
      %49 = vector.extract_strided_slice %38 {offsets = [2, 0], sizes = [14, 9], strides = [1, 1]} : vector<18x9xf32> to vector<14x9xf32>
      %50 = vector.extract_strided_slice %38 {offsets = [2, 0], sizes = [14, 9], strides = [1, 1]} : vector<18x9xf32> to vector<14x9xf32>
      %51 = vector.extract_strided_slice %35 {offsets = [3, 0], sizes = [14, 9], strides = [1, 1]} : vector<18x9xf32> to vector<14x9xf32>
      %52 = vector.extract_strided_slice %35 {offsets = [3, 0], sizes = [14, 9], strides = [1, 1]} : vector<18x9xf32> to vector<14x9xf32>
      %53 = vector.extract_strided_slice %38 {offsets = [3, 0], sizes = [14, 9], strides = [1, 1]} : vector<18x9xf32> to vector<14x9xf32>
      %54 = vector.extract_strided_slice %38 {offsets = [3, 0], sizes = [14, 9], strides = [1, 1]} : vector<18x9xf32> to vector<14x9xf32>
      %55 = vector.extract_strided_slice %35 {offsets = [4, 0], sizes = [14, 9], strides = [1, 1]} : vector<18x9xf32> to vector<14x9xf32>
      %56 = tpu.concatenate %40, %42, %44, %46, %48, %50, %52, %54 in 1 : vector<14x9xf32>, vector<14x9xf32>, vector<14x9xf32>, vector<14x9xf32>, vector<14x9xf32>, vector<14x9xf32>, vector<14x9xf32>, vector<14x9xf32> -> vector<14x72xf32>
      %57 = tpu.concatenate %41, %43, %45, %47, %49, %51, %53, %55 in 1 : vector<14x9xf32>, vector<14x9xf32>, vector<14x9xf32>, vector<14x9xf32>, vector<14x9xf32>, vector<14x9xf32>, vector<14x9xf32>, vector<14x9xf32> -> vector<14x72xf32>
      %58 = tpu.concatenate %56, %57 in 0 : vector<14x72xf32>, vector<14x72xf32> -> vector<28x72xf32>
      %cst_25 = arith.constant dense<0.000000e+00> : vector<28x32xf32>
      %59 = tpu.matmul %58, %1, %cst_25 {dimension_numbers = #tpu.dot_dimension_numbers<[1], [0], [0], [1], [0, 0, 1, 1], [], []>} : vector<28x72xf32>, vector<72x32xf32>, vector<28x32xf32> -> vector<28x32xf32>
      %60 = vector.extract_strided_slice %59 {offsets = [0, 0], sizes = [14, 32], strides = [1, 1]} : vector<28x32xf32> to vector<14x32xf32>
      %61 = vector.extract_strided_slice %59 {offsets = [14, 0], sizes = [14, 32], strides = [1, 1]} : vector<28x32xf32> to vector<14x32xf32>
      %62 = arith.maximumf %60, %61 : vector<14x32xf32>
      %63 = vector.broadcast %3 : vector<1x32xf32> to vector<14x32xf32>
      %64 = arith.addf %62, %63 : vector<14x32xf32>
      %cst_26 = arith.constant 0.000000e+00 : f32
      %65 = vector.broadcast %cst_26 : f32 to vector<14x32xf32>
      %66 = arith.maximumf %64, %65 : vector<14x32xf32>
      %cst_27 = arith.constant 0.000000e+00 : f32
      %67 = vector.broadcast %cst_27 : f32 to vector<4x32xf32>
      %68 = vector.extract_strided_slice %66 {offsets = [0, 0], sizes = [5, 32], strides = [1, 1]} : vector<14x32xf32> to vector<5x32xf32>
      %69 = vector.extract_strided_slice %66 {offsets = [9, 0], sizes = [5, 32], strides = [1, 1]} : vector<14x32xf32> to vector<5x32xf32>
      %70 = tpu.concatenate %67, %68, %67, %67, %69, %67 in 0 : vector<4x32xf32>, vector<5x32xf32>, vector<4x32xf32>, vector<4x32xf32>, vector<5x32xf32>, vector<4x32xf32> -> vector<26x32xf32>
      %71 = vector.extract_strided_slice %70 {offsets = [0, 0], sizes = [19, 32], strides = [1, 1]} : vector<26x32xf32> to vector<19x32xf32>
      %72 = vector.extract_strided_slice %70 {offsets = [1, 0], sizes = [19, 32], strides = [1, 1]} : vector<26x32xf32> to vector<19x32xf32>
      %73 = vector.extract_strided_slice %70 {offsets = [2, 0], sizes = [19, 32], strides = [1, 1]} : vector<26x32xf32> to vector<19x32xf32>
      %74 = vector.extract_strided_slice %70 {offsets = [3, 0], sizes = [19, 32], strides = [1, 1]} : vector<26x32xf32> to vector<19x32xf32>
      %75 = vector.extract_strided_slice %70 {offsets = [4, 0], sizes = [19, 32], strides = [1, 1]} : vector<26x32xf32> to vector<19x32xf32>
      %76 = vector.extract_strided_slice %70 {offsets = [5, 0], sizes = [19, 32], strides = [1, 1]} : vector<26x32xf32> to vector<19x32xf32>
      %77 = vector.extract_strided_slice %70 {offsets = [6, 0], sizes = [19, 32], strides = [1, 1]} : vector<26x32xf32> to vector<19x32xf32>
      %78 = vector.extract_strided_slice %70 {offsets = [7, 0], sizes = [19, 32], strides = [1, 1]} : vector<26x32xf32> to vector<19x32xf32>
      %79 = tpu.concatenate %71, %72, %73, %74, %75, %76, %77, %78 in 1 : vector<19x32xf32>, vector<19x32xf32>, vector<19x32xf32>, vector<19x32xf32>, vector<19x32xf32>, vector<19x32xf32>, vector<19x32xf32>, vector<19x32xf32> -> vector<19x256xf32>
      %cst_28 = arith.constant dense<0.000000e+00> : vector<19x64xf32>
      %80 = tpu.matmul %79, %5, %cst_28 {dimension_numbers = #tpu.dot_dimension_numbers<[1], [0], [0], [1], [0, 0, 1, 1], [], []>} : vector<19x256xf32>, vector<256x64xf32>, vector<19x64xf32> -> vector<19x64xf32>
      %81 = vector.broadcast %7 : vector<1x64xf32> to vector<19x64xf32>
      %82 = arith.addf %80, %81 : vector<19x64xf32>
      %cst_29 = arith.constant 0.000000e+00 : f32
      %83 = vector.broadcast %cst_29 : f32 to vector<19x64xf32>
      %84 = arith.maximumf %82, %83 : vector<19x64xf32>
      %cst_30 = arith.constant dense<0.000000e+00> : vector<2x64xf32>
      %85 = tpu.matmul %39, %84, %cst_30 {dimension_numbers = #tpu.dot_dimension_numbers<[1], [0], [0], [1], [0, 0, 1, 1], [], []>} : vector<2x19xf32>, vector<19x64xf32>, vector<2x64xf32> -> vector<2x64xf32>
      %cst_31 = arith.constant dense<0.000000e+00> : vector<2x64xf32>
      %86 = tpu.matmul %85, %9, %cst_31 {dimension_numbers = #tpu.dot_dimension_numbers<[1], [0], [0], [1], [0, 0, 1, 1], [], []>} : vector<2x64xf32>, vector<64x64xf32>, vector<2x64xf32> -> vector<2x64xf32>
      %87 = vector.broadcast %11 : vector<1x64xf32> to vector<2x64xf32>
      %88 = arith.addf %86, %87 : vector<2x64xf32>
      %c0_32 = arith.constant 0 : index
      %c0_33 = arith.constant 0 : index
      %c0_34 = arith.constant 0 : index
      %89 = vector.load %arg13[%c0_32, %c0_33, %c0_34] : memref<1x2x64xf32, #tpu.memory_space<vmem>>, vector<1x2x64xf32>
      %90 = vector.shape_cast %89 : vector<1x2x64xf32> to vector<2x64xf32>
      %91 = vector.shape_cast %85 : vector<2x64xf32> to vector<1x2x64xf32>
      tpu.vector_store %arg13[%c0_32, %c0_33, %c0_34], %91 {strides = array<i32>} : memref<1x2x64xf32, #tpu.memory_space<vmem>>, vector<1x2x64xf32>,
      %c0_35 = arith.constant 0 : index
      %c0_36 = arith.constant 0 : index
      %c0_37 = arith.constant 0 : index
      %92 = vector.load %arg14[%c0_35, %c0_36, %c0_37] : memref<1x2x64xf32, #tpu.memory_space<vmem>>, vector<1x2x64xf32>
      %93 = vector.shape_cast %92 : vector<1x2x64xf32> to vector<2x64xf32>
      %94 = vector.shape_cast %88 : vector<2x64xf32> to vector<1x2x64xf32>
      tpu.vector_store %arg14[%c0_35, %c0_36, %c0_37], %94 {strides = array<i32>} : memref<1x2x64xf32, #tpu.memory_space<vmem>>, vector<1x2x64xf32>,
    } else {
    }
    return
  }
  func.func @transform_0(%arg0: i32) -> (i32, i32, i32) {
    %c0_i32 = arith.constant 0 : i32
    %c0_i32_0 = arith.constant 0 : i32
    %c0_i32_1 = arith.constant 0 : i32
    return %arg0, %c0_i32, %c0_i32_0 : i32, i32, i32
  }
  func.func @transform_1(%arg0: i32) -> (i32, i32, i32) {
    %c0_i32 = arith.constant 0 : i32
    %c0_i32_0 = arith.constant 0 : i32
    %c0_i32_1 = arith.constant 0 : i32
    return %arg0, %c0_i32, %c0_i32_0 : i32, i32, i32
  }
  func.func @transform_2(%arg0: i32) -> (i32, i32, i32) {
    %c0_i32 = arith.constant 0 : i32
    %c0_i32_0 = arith.constant 0 : i32
    %c0_i32_1 = arith.constant 0 : i32
    return %arg0, %c0_i32, %c0_i32_0 : i32, i32, i32
  }
  func.func @transform_3(%arg0: i32) -> (i32, i32, i32) {
    %c0_i32 = arith.constant 0 : i32
    %c0_i32_0 = arith.constant 0 : i32
    %c0_i32_1 = arith.constant 0 : i32
    return %arg0, %c0_i32, %c0_i32_0 : i32, i32, i32
  }
  func.func @transform_4(%arg0: i32) -> (i32, i32, i32) {
    %c0_i32 = arith.constant 0 : i32
    %c0_i32_0 = arith.constant 0 : i32
    %c0_i32_1 = arith.constant 0 : i32
    return %arg0, %c0_i32, %c0_i32_0 : i32, i32, i32
  }
  func.func @transform_5(%arg0: i32) -> (i32, i32, i32) {
    %c0_i32 = arith.constant 0 : i32
    %c0_i32_0 = arith.constant 0 : i32
    %c0_i32_1 = arith.constant 0 : i32
    return %arg0, %c0_i32, %c0_i32_0 : i32, i32, i32
  }
  func.func @transform_6(%arg0: i32) -> (i32, i32) {
    %c0_i32 = arith.constant 0 : i32
    %c0_i32_0 = arith.constant 0 : i32
    %c0_i32_1 = arith.constant 0 : i32
    return %c0_i32, %c0_i32_0 : i32, i32
  }
  func.func @transform_7(%arg0: i32) -> (i32, i32) {
    %c0_i32 = arith.constant 0 : i32
    %c0_i32_0 = arith.constant 0 : i32
    %c0_i32_1 = arith.constant 0 : i32
    return %c0_i32, %c0_i32_0 : i32, i32
  }
  func.func @transform_8(%arg0: i32) -> (i32, i32) {
    %c0_i32 = arith.constant 0 : i32
    %c0_i32_0 = arith.constant 0 : i32
    %c0_i32_1 = arith.constant 0 : i32
    return %c0_i32, %c0_i32_0 : i32, i32
  }
  func.func @transform_9(%arg0: i32) -> (i32, i32) {
    %c0_i32 = arith.constant 0 : i32
    %c0_i32_0 = arith.constant 0 : i32
    %c0_i32_1 = arith.constant 0 : i32
    return %c0_i32, %c0_i32_0 : i32, i32
  }
  func.func @transform_10(%arg0: i32) -> (i32, i32) {
    %c0_i32 = arith.constant 0 : i32
    %c0_i32_0 = arith.constant 0 : i32
    %c0_i32_1 = arith.constant 0 : i32
    return %c0_i32, %c0_i32_0 : i32, i32
  }
  func.func @transform_11(%arg0: i32) -> (i32, i32) {
    %c0_i32 = arith.constant 0 : i32
    %c0_i32_0 = arith.constant 0 : i32
    %c0_i32_1 = arith.constant 0 : i32
    return %c0_i32, %c0_i32_0 : i32, i32
  }
  func.func @transform_12(%arg0: i32) -> (i32, i32, i32) {
    %c0_i32 = arith.constant 0 : i32
    %c0_i32_0 = arith.constant 0 : i32
    %c0_i32_1 = arith.constant 0 : i32
    return %arg0, %c0_i32, %c0_i32_0 : i32, i32, i32
  }
  func.func @transform_13(%arg0: i32) -> (i32, i32, i32) {
    %c0_i32 = arith.constant 0 : i32
    %c0_i32_0 = arith.constant 0 : i32
    %c0_i32_1 = arith.constant 0 : i32
    return %arg0, %c0_i32, %c0_i32_0 : i32, i32, i32
  }
}

</mosaic_0001>

<bundles_post_ra>
// kernel: tfc_forward.1
= control target key start
LH: loop header
LB: loop body
LE: loop exit
PB: predicated region body
PF: predicated region fallthrough
CT: control target
= control target key end

     0   :  { %s2926_s25 = smov 0   ;;  %s3835_s0 = inlined_call_operand.vmem [shape: f32[2,72,32], index: 0, kind: input, shape index: {}]   ;;  %s3836_s1 = inlined_call_operand.vmem [shape: f32[2,1,32], index: 1, kind: input, shape index: {}]   ;;  %s3837_s2 = inlined_call_operand.vmem [shape: f32[2,256,64], index: 2, kind: input, shape index: {}]   ;;  %s3838_s3 = inlined_call_operand.vmem [shape: f32[2,1,64], index: 3, kind: input, shape index: {}]   ;;  %s3839_s4 = inlined_call_operand.vmem [shape: f32[2,64,64], index: 4, kind: input, shape index: {}]   ;;  %s3840_s5 = inlined_call_operand.vmem [shape: f32[2,1,64], index: 5, kind: input, shape index: {}]   ;;  %s3841_s6 = inlined_call_operand.vmem [shape: f32[24,9], index: 6, kind: input, shape index: {}]   ;;  %s3842_s7 = inlined_call_operand.vmem [shape: f32[24,9], index: 7, kind: input, shape index: {}]   ;;  %s3843_s8 = inlined_call_operand.vmem [shape: f32[16,18], index: 8, kind: input, shape index: {}]   ;;  %s3844_s9 = inlined_call_operand.vmem [shape: f32[36,16], index: 9, kind: input, shape index: {}]   ;;  %s3845_s10 = inlined_call_operand.vmem [shape: f32[2,25], index: 10, kind: input, shape index: {}]   ;;  %s3846_s11 = inlined_call_operand.vmem [shape: f32[2,19], index: 11, kind: input, shape index: {}]   ;;  %s3847_s12 = inlined_call_operand.vmem [shape: f32[2,2,64], index: 12, kind: output, shape index: {0}]   ;;  %s3848_s13 = inlined_call_operand.vmem [shape: f32[2,2,64], index: 13, kind: output, shape index: {1}]  }
   0x1 LB: > { %s2932_s26 = sadd.s32 4294967295, %s2829_s25   ;;  %p2362_p0 = scmp.ge.s32.totalorder %s2829_s25, 1  ;;  %s2829_s25 = sphi %s2926_s25, %s24_s25  }
   0x2   : > { %p434_p1 = scmp.lt.s32.totalorder %s2829_s25, 3 }
   0x4   : > { %p435_p2 = pnand %p2362_p0, %p434_p1 }
   0x6   : > { %438 = sbr.rel (%p435_p2) target bundleno = 2661 (0xa65), region = 68 }
   0xb   : > { %p500_p3 = scmp.lt.s32.totalorder %s2932_s26, 1  ;;  %p2370_p4 = scmp.ne.s32.totalorder %s2932_s26, 0 }
   0xc   : > { %s2832_s23 = smov (!%p2370_p4), 27   ;;  %s2836_s30 = smov (!%p2370_p4), 45  }
   0xd   : > { %s2938_s27 = scalar_select %p500_p3, %s2932_s26, 1 }
   0xe   : > { %s2839_s16 = smov (!%p2370_p4), 63   ;;  %s2841_s19 = smov (!%p2370_p4), 32  }
   0xf   : > { %s2676_s28 = smul.u32 72, %s2938_s27  ;;  %s507_s14 = scalar_lea.vmem %s3836_s1, %s2938_s27 }
  0x10   : > { %s2394_s15 = sshll.u32 %s2938_s27, 8  ;;  %s515_s18 = scalar_lea.vmem %s3838_s3, %s2938_s27  ;;  %v2950_v0 = vld [vmem:[%s507_s14] sm:$0x1] }
  0x11   : > { %3875 = vst [vmem:[#allocation2_spill] sm:$0xff] %v2950_v0  ;;  %s504_s21 = scalar_lea.vmem %s3835_s0, %s2676_s28  ;;  %v2955_v1 = vld [vmem:[%s515_s18] sm:$0x1]  ;;  %s2960_s24 = scalar_lea.vmem %s3837_s2, %s2394_s15 }
  0x12   : > { %v2962_v2 = vld [vmem:[%s504_s21] sm:$0xff]  ;;  %v2964_v3 = vld [vmem:[%s504_s21 + $0x8] sm:$0xff]  ;;  %v2966_v4 = vld [vmem:[%s504_s21 + $0x10] sm:$0xff]  ;;  %s2368_s28 = sshll.u32 %s2938_s27, 1  ;;  %s2395_s18 = sshll.u32 %s2938_s27, 6 }
  0x13   : > { %v2969_v5 = vld [vmem:[%s504_s21 + $0x18] sm:$0xff]  ;;  %v2971_v6 = vld [vmem:[%s504_s21 + $0x20] sm:$0xff]  ;;  %v2973_v7 = vld [vmem:[%s504_s21 + $0x28] sm:$0xff]  ;;  %s2978_s14 = scalar_lea.vmem %s3847_s12, %s2368_s28  ;;  %s2983_s17 = scalar_lea.vmem %s3848_s13, %s2368_s28 }
  0x14   : > { %v2985_v8 = vld [vmem:[%s504_s21 + $0x30] sm:$0xff]  ;;  %v2987_v9 = vld [vmem:[%s504_s21 + $0x38] sm:$0xff]  ;;  %v2989_v10 = vld [vmem:[%s504_s21 + $0x40] sm:$0xff]  ;;  %s520_s21 = scalar_lea.vmem %s3839_s4, %s2395_s18  ;;  %s523_s28 = scalar_lea.vmem %s3840_s5, %s2938_s27 }
  0x15   : > { %v2992_v11 = vld [vmem:[%s2960_s24] sm:$0xff]  ;;  %v2995_v12 = vld [vmem:[%s2960_s24 + $0x8] sm:$0xff]  ;;  %v2998_v13 = vld [vmem:[%s2960_s24 + $0x10] sm:$0xff]  ;;  %s2831_s18 = smov (!%p2370_p4), 9   ;;  %s2834_s27 = smov (!%p2370_p4), 36  }
  0x16   : > { %3876 = vst [vmem:[#allocation3_spill] sm:$0xff] %v2992_v11  ;;  %3877 = vst [vmem:[#allocation4_spill] sm:$0xff] %v2995_v12  ;;  %v3001_v14 = vld [vmem:[%s2960_s24 + $0x18] sm:$0xff]  ;;  %v3004_v15 = vld [vmem:[%s2960_s24 + $0x20] sm:$0xff]  ;;  %s2838_s15 = smov (!%p2370_p4), 54   ;;  %s2842_s20 = smov (!%p2370_p4), 96  }
  0x17   : > { %3878 = vst [vmem:[#allocation5_spill] sm:$0xff] %v2998_v13  ;;  %3879 = vst [vmem:[#allocation6_spill] sm:$0xff] %v3001_v14  ;;  %v3007_v16 = vld [vmem:[%s2960_s24 + $0x28] sm:$0xff]  ;;  %v3010_v17 = vld [vmem:[%s2960_s24 + $0x30] sm:$0xff] }
  0x18   : > { %3880 = vst [vmem:[#allocation7_spill] sm:$0xff] %v3004_v15  ;;  %3881 = vst [vmem:[#allocation8_spill] sm:$0xff] %v3007_v16  ;;  %v3013_v18 = vld [vmem:[%s2960_s24 + $0x38] sm:$0xff]  ;;  %v3016_v19 = vld [vmem:[%s2960_s24 + $0x40] sm:$0xff] }
  0x19   : > { %v3019_v20 = vld [vmem:[%s2960_s24 + $0x48] sm:$0xff]  ;;  %v3022_v21 = vld [vmem:[%s2960_s24 + $0x50] sm:$0xff]  ;;  %v3025_v22 = vld [vmem:[%s2960_s24 + $0x58] sm:$0xff] }
  0x1a   : > { %3882 = vst [vmem:[#allocation9_spill] sm:$0xff] %v3022_v21  ;;  %v3029_v23 = vld [vmem:[%s2960_s24 + $0x60] sm:$0xff]  ;;  %v3032_v24 = vld [vmem:[%s2960_s24 + $0x68] sm:$0xff]  ;;  %v3035_v25 = vld [vmem:[%s2960_s24 + $0x70] sm:$0xff] }
  0x1b   : > { %3883 = vst [vmem:[#allocation10_spill] sm:$0xff] %v3029_v23  ;;  %3884 = vst [vmem:[#allocation11_spill] sm:$0xff] %v3035_v25  ;;  %v3038_v26 = vld [vmem:[%s2960_s24 + $0x78] sm:$0xff]  ;;  %v3041_v27 = vld [vmem:[%s2960_s24 + $0x80] sm:$0xff] }
  0x1c   : > { %3885 = vst [vmem:[#allocation12_spill] sm:$0xff] %v3038_v26  ;;  %3886 = vst [vmem:[#allocation13_spill] sm:$0xff] %v3041_v27  ;;  %v3044_v28 = vld [vmem:[%s2960_s24 + $0x88] sm:$0xff]  ;;  %v3047_v29 = vld [vmem:[%s2960_s24 + $0x90] sm:$0xff] }
  0x1d   : > { %3887 = vst [vmem:[#allocation14_spill] sm:$0xff] %v3044_v28  ;;  %3888 = vst [vmem:[#allocation15_spill] sm:$0xff] %v3047_v29  ;;  %v3050_v30 = vld [vmem:[%s2960_s24 + $0x98] sm:$0xff]  ;;  %v3053_v31 = vld [vmem:[%s2960_s24 + $0xa0] sm:$0xff] }
  0x1e   : > { %3889 = vst [vmem:[#allocation16_spill] sm:$0xff] %v3050_v30  ;;  %3890 = vst [vmem:[#allocation17_spill] sm:$0xff] %v3053_v31  ;;  %v3059_v32 = vld [vmem:[%s2960_s24 + $0xa8] sm:$0xff]  ;;  %v3062_v33 = vld [vmem:[%s2960_s24 + $0xb0] sm:$0xff] }
  0x1f   : > { %v3065_v34 = vld [vmem:[%s2960_s24 + $0xb8] sm:$0xff]  ;;  %v3068_v35 = vld [vmem:[%s2960_s24 + $0xc0] sm:$0xff]  ;;  %v3071_v36 = vld [vmem:[%s2960_s24 + $0xc8] sm:$0xff] }
  0x20   : > { %v3074_v37 = vld [vmem:[%s2960_s24 + $0xd0] sm:$0xff]  ;;  %v3077_v38 = vld [vmem:[%s2960_s24 + $0xd8] sm:$0xff]  ;;  %v3080_v39 = vld [vmem:[%s2960_s24 + $0xe0] sm:$0xff] }
  0x21   : > { %3891 = vst [vmem:[#allocation18_spill] sm:$0xff] %v3074_v37  ;;  %3892 = vst [vmem:[#allocation19_spill] sm:$0xff] %v3077_v38  ;;  %v3083_v40 = vld [vmem:[%s2960_s24 + $0xe8] sm:$0xff]  ;;  %v3090_v41 = vld [vmem:[%s2960_s24 + $0xf0] sm:$0xff]  ;;  %587 = sbr.rel (%p2370_p4) target bundleno = 1181 (0x49d), region = 72 }
  0x22   : > { %3893 = vst [vmem:[#allocation20_spill] sm:$0xff] %v3090_v41  ;;  %v3093_v42 = vld [vmem:[%s2960_s24 + $0xf8] sm:$0xff]  ;;  %v3095_v43 = vld [vmem:[%s520_s21] sm:$0xff]  ;;  %v3097_v44 = vld [vmem:[%s520_s21 + $0x8] sm:$0xff] }
  0x23   : > { %3894 = vst [vmem:[#allocation21_spill] sm:$0xff] %v3093_v42  ;;  %v3099_v45 = vld [vmem:[%s520_s21 + $0x10] sm:$0xff]  ;;  %v3101_v46 = vld [vmem:[%s520_s21 + $0x18] sm:$0xff]  ;;  %v3103_v47 = vld [vmem:[%s520_s21 + $0x20] sm:$0xff] }
  0x24   : > { %v3105_v48 = vld [vmem:[%s520_s21 + $0x28] sm:$0xff]  ;;  %v3107_v49 = vld [vmem:[%s520_s21 + $0x30] sm:$0xff]  ;;  %v3109_v50 = vld [vmem:[%s520_s21 + $0x38] sm:$0xff] }
  0x25   : > { %v3111_v51 = vld [vmem:[%s523_s28] sm:$0x1]  ;;  %s2833_s28 = smov (!%p2370_p4), 18  }
  0x26   : > { %v3117_v52 = vld [vmem:[%s3842_s7] sm:$0xff]  ;;  %v3122_v53 = vld [vmem:[%s3842_s7 + $0x8] sm:$0xff]  ;;  %vm610_vm0 = vcmask 1046528   ;;  %2410 = vmatprep.subr.mxu1 %v3093_v42  ;;  %vm639_vm1 = vcmask 1045504   ;;  %v3151_v63 = vld [vmem:[%s3841_s6 + $0x10] sm:$0xff]  ;;  %vm668_vm2 = vcmask 1044480  }
  0x27   : > { %v3127_v54 = vld [vmem:[%s3841_s6] sm:$0xff]  ;;  %598 = vrot.lane.b32.xlu0 %v3117_v52, %s2831_s18  ;;  %v625_v55 = vrot.slane %v3117_v52, 1  ;;  %v626_v56 = vrot.slane %v3122_v53, 1  ;;  %v3137_v57 = vld [vmem:[%s3841_s6 + $0x8] sm:$0xff]  ;;  %2411 = vmatpush3.msra.mxu1 %v3038_v26  ;;  %v3168_v42 = vrot.slane %v3151_v63, 1  ;;  %vm2837_vm3 = vmmov 0  }
  0x28   : > { %v611_v58 = vrot.slane %v3127_v54, 1  ;;  %v612_v59 = vrot.slane %v3137_v57, 1  ;;  %v640_v60 = vrot.slane %v3127_v54, 2  ;;  %v3853_v61 = vrot.slane %v3137_v57, 2  ;;  %2412 = vmatprep.subr.mxu1 %v3090_v41 }
  0x29   : > { %v3146_v62 = vsel %vm610_vm0, %v625_v55, %v626_v56  ;;  %2413 = vmatpush3.msra.mxu1 %v3035_v25  ;;  %v654_v41 = vrot.slane %v3117_v52, 2  ;;  %v3856_v25 = vrot.slane %v3122_v53, 2  ;;  %vm779_vm4 = vcmask 1043456  }
  0x2a   : > { %630 = vrot.lane.b32.xlu1 %v3146_v62, %s2832_s23  ;;  %v613_v26 = vsel %vm610_vm0, %v611_v58, %v612_v59  ;;  %2414 = vmatprep.subr.mxu1 %v3083_v40  ;;  %v3162_v55 = vsel %vm639_vm1, %v640_v60, %v3853_v61  ;;  %v669_v60 = vrot.slane %v3127_v54, 3  ;;  %v3859_v61 = vrot.slane %v3137_v57, 3 }
  0x2b   : > { %616 = vrot.lane.b32.xlu0 %v613_v26, %s2833_s28  ;;  %2415 = vmatpush3.msra.mxu1 %v3032_v24  ;;  %v3180_v58 = vsel %vm639_vm1, %v654_v41, %v3856_v25  ;;  %v3861_v41 = vmov 0.0   ;;  %vm697_vm5 = vcmask 72704   ;;  %vm701_vm6 = vcmask 146432  }
  0x2c   : > { %2416 = vmatprep.subr.mxu1 %v3080_v39  ;;  %2542 = vmatprep.subr.mxu0 %v3861_v41  ;;  %vm705_vm7 = vcmask 220160   ;;  %vm709_vm8 = vcmask 293888   ;;  %vm713_vm9 = vcmask 367616   ;;  %vm717_vm10 = vcmask 441344  }
  0x2d   : > { %2417 = vmatpush3.msra.mxu1 %v3029_v23  ;;  %v3187_v23 = vsel %vm610_vm0, %v612_v59, %v3168_v42  ;;  %2543 = vmatpush3.msra.mxu0 %v2989_v10  ;;  %v3205_v59 = vsel %vm668_vm2, %v669_v60, %v3859_v61  ;;  %vm721_vm11 = vcmask 515072   ;;  %vm825_vm12 = vcmask 588800  }
  0x2e   : > { %645 = vrot.lane.b32.xlu1 %v3162_v55, %s2834_s27  ;;  %2418 = vmatprep.subr.mxu1 %v3077_v38  ;;  %v3192_v38 = vld [vmem:[%s3842_s7 + $0x10] sm:$0xff]  ;;  %vm1054_vm13 = vcmask 1041408   ;;  %vm1034_vm14 = vcmask 1042432   ;;  %vm1074_vm15 = vcmask 1040384  }
  0x2f   : > { %600 = vrot.lane.b32.xlu0 %v3122_v53, %s2831_s18  ;;  %2419 = vmatpush3.msra.mxu1 %v3025_v22  ;;  %v3208_v25 = vrot.slane %v3192_v38, 1 }
  0x30   : > { %2420 = vmatprep.subr.mxu1 %v3074_v37  ;;  %2544 = vmatprep.subr.mxu0 %v3861_v41  ;;  %v3860_v37 = vrot.slane %v3122_v53, 3 }
  0x31   : > { %2421 = vmatpush3.msra.mxu1 %v3022_v21  ;;  %v683_v21 = vrot.slane %v3117_v52, 3  ;;  %2545 = vmatpush3.msra.mxu0 %v2987_v9  ;;  %v629_v60 = vsel %vm610_vm0, %v626_v56, %v3208_v25 }
  0x32   : > { %659 = vrot.lane.b32.xlu1 %v3180_v58, %s2836_s30  ;;  %2560 = vmatprep.mubr.msk.f32.mxu0 %vm2837_vm3, %v3861_v41 }
  0x33   : > { %618 = vrot.lane.b32.xlu0 %v3187_v23, %s2833_s28  ;;  %2546 = vmatprep.subr.mxu0 %v3861_v41  ;;  %v685_v61 = vsel %vm668_vm2, %v683_v21, %v3860_v37  ;;  %v3895_v21 = vrot.slane %v3137_v57, 2  ;;  %v657_v37 = vrot.slane %v3192_v38, 2 }
  0x34   : > { %2422 = vmatprep.subr.mxu1 %v3071_v36  ;;  %2547 = vmatpush3.msra.mxu0 %v2985_v8 }
  0x35   : > { %2548 = vmatprep.subr.mxu0 %v3861_v41  ;;  %2423 = vmatpush3.msra.mxu1 %v3019_v20 }
  0x36   : > { %674 = vrot.lane.b32.xlu1 %v3205_v59, %s2838_s15  ;;  %2549 = vmatpush3.msra.mxu0 %v2973_v7 }
  0x37   : > { %725 = vrot.lane.b32.xlu0 %v613_v26, %s2831_s18  ;;  %2550 = vmatprep.subr.mxu0 %v3861_v41  ;;  %v3236_v26 = vrot.slane %v3151_v63, 2 }
  0x38   : > { %2424 = vmatprep.subr.mxu1 %v3068_v35  ;;  %2551 = vmatpush3.msra.mxu0 %v2971_v6 }
  0x39   : > { %2552 = vmatprep.subr.mxu0 %v3861_v41  ;;  %2425 = vmatpush3.msra.mxu1 %v3016_v19  ;;  %v644_v56 = vsel %vm639_vm1, %v3895_v21, %v3236_v26 }
  0x3a   : > { %632 = vrot.lane.b32.xlu1 %v629_v60, %s2832_s23  ;;  %2553 = vmatpush3.msra.mxu0 %v2969_v5 }
  0x3b   : > { %688 = vrot.lane.b32.xlu0 %v685_v61, %s2839_s16  ;;  %2554 = vmatprep.subr.mxu0 %v3861_v41 }
  0x3c   : > { %2426 = vmatprep.subr.mxu1 %v3065_v34  ;;  %2555 = vmatpush3.msra.mxu0 %v2966_v4 }
  0x3d   : > { %2556 = vmatprep.subr.mxu0 %v3861_v41  ;;  %2427 = vmatpush3.msra.mxu1 %v3013_v18 }
  0x3e   : > { %734 = vrot.lane.b32.xlu1 %v3146_v62, %s2833_s28  ;;  %2557 = vmatpush3.msra.mxu0 %v2964_v3  ;;  %v3896_v62 = vrot.slane %v3122_v53, 2 }
  0x3f   : > { %602 = vrot.lane.b32.xlu0 %v3192_v38, %s2831_s18  ;;  %2558 = vmatprep.subr.mxu0 %v3861_v41 }
  0x40   : > { %2428 = vmatprep.subr.mxu1 %v3062_v33  ;;  %2559 = vmatpush3.msra.mxu0 %v2962_v2  ;;  %v658_v21 = vsel %vm639_vm1, %v3896_v62, %v657_v37  ;;  %v3897_v62 = vrot.slane %v3137_v57, 3 }
  0x41   : > { %2429 = vmatpush3.msra.mxu1 %v3010_v17  ;;  %2575 = vmatprep.subr.mxu0 %v3861_v41 }
  0x42   : > { %647 = vrot.lane.b32.xlu1 %v644_v56, %s2834_s27  ;;  %2430 = vmatprep.subr.mxu1 %v3059_v32 }
  0x43   : > { %743 = vrot.lane.b32.xlu0 %v3162_v55, %s2832_s23  ;;  %2431 = vmatpush3.msra.mxu1 %v3007_v16  ;;  %v672_v55 = vrot.slane %v3151_v63, 3 }
  0x44   : > { %2432 = vmatprep.subr.mxu1 %v3053_v31 }
  0x45   : > { %2433 = vmatpush3.msra.mxu1 %v3004_v15  ;;  %v673_v41 = vsel %vm668_vm2, %v3897_v62, %v672_v55  ;;  %v3899_v62 = vrot.slane %v3122_v53, 3 }
  0x46   : > { %620 = vrot.lane.b32.xlu1 %v3168_v42, %s2833_s28  ;;  %2434 = vmatprep.subr.mxu1 %v3050_v30 }
  0x47   : > { %661 = vrot.lane.b32.xlu0 %v658_v21, %s2836_s30  ;;  %2435 = vmatpush3.msra.mxu1 %v3001_v14 }
  0x48   : > { %2436 = vmatprep.subr.mxu1 %v3047_v29  ;;  %v3898_v29 = vmov 0.0  }
  0x49   : > { %2437 = vmatpush3.msra.mxu1 %v2998_v13 }
  0x4a   : > { %752 = vrot.lane.b32.xlu1 %v3180_v58, %s2834_s27  ;;  %2438 = vmatprep.subr.mxu1 %v3044_v28  ;;  %v686_v58 = vrot.slane %v3192_v38, 3 }
  0x4b   : > { %634 = vrot.lane.b32.xlu0 %v3208_v25, %s2832_s23  ;;  %2439 = vmatpush3.msra.mxu1 %v2995_v12 }
  0x4c   : > { %2440 = vmatprep.subr.mxu1 %v3041_v27  ;;  %v687_v12 = vsel %vm668_vm2, %v3899_v62, %v686_v58 }
  0x4d   : > { %2441 = vmatpush3.msra.mxu1 %v2992_v11  ;;  %v781_v11 = vrot.slane %v3137_v57, 4 }
  0x4e   : > { %676 = vrot.lane.b32.xlu1 %v673_v41, %s2838_s15  ;;  %2586 = vmatprep.subr.mxu1 %v3898_v29 }
  0x4f   : > { %727 = vrot.lane.b32.xlu0 %v3187_v23, %s2831_s18  ;;  %v780_v23 = vrot.slane %v3127_v54, 4 }
  0x52   : > { %761 = vrot.lane.b32.xlu1 %v3205_v59, %s2836_s30  ;;  %v782_v59 = vsel %vm779_vm4, %v780_v23, %v781_v11 }
  0x53   : > { %649 = vrot.lane.b32.xlu0 %v3236_v26, %s2834_s27 }
  0x56   : > { %690 = vrot.lane.b32.xlu1 %v687_v12, %s2839_s16 }
  0x57   : > { %736 = vrot.lane.b32.xlu0 %v629_v60, %s2833_s28  ;;  %v783_v60 = vrot.slane %v3151_v63, 4 }
  0x5a   : > { %770 = vrot.lane.b32.xlu1 %v685_v61, %s2838_s15  ;;  %v784_v61 = vsel %vm779_vm4, %v781_v11, %v783_v60 }
  0x5b   : > { %663 = vrot.lane.b32.xlu0 %v657_v37, %s2836_s30 }
  0x5e   : > { %745 = vrot.lane.b32.xlu1 %v644_v56, %s2832_s23 }
  0x5f   : > { %785 = vrot.lane.b32.xlu0 %v782_v59, %s2839_s16 }
  0x62   : > { %678 = vrot.lane.b32.xlu1 %v672_v55, %s2838_s15 }
  0x63   : > { %754 = vrot.lane.b32.xlu0 %v658_v21, %s2834_s27 }
  0x66   : > { %692 = vrot.lane.b32.xlu1 %v686_v58, %s2839_s16 }
  0x67   : > { %763 = vrot.lane.b32.xlu0 %v673_v41, %s2836_s30 }
  0x6a   : > { %772 = vrot.lane.b32.xlu1 %v687_v12, %s2838_s15 }
  0x6b   : > { %729 = vrot.lane.b32.xlu0 %v3168_v42, %s2831_s18  ;;  %s2840_s18 = smov 64  }
  0x6e   : > { %787 = vrot.lane.b32.xlu1 %v784_v61, %s2839_s16 }
  0x6f   : > { %738 = vrot.lane.b32.xlu0 %v3208_v25, %s2833_s28 }
  0x72   : > { %747 = vrot.lane.b32.xlu1 %v3236_v26, %s2832_s23 }
  0x73   : > { %756 = vrot.lane.b32.xlu0 %v657_v37, %s2834_s27 }
  0x76   : > { %765 = vrot.lane.b32.xlu1 %v672_v55, %s2836_s30 }
  0x77   : > { %774 = vrot.lane.b32.xlu0 %v686_v58, %s2838_s15 }
  0x7a   : > { %789 = vrot.lane.b32.xlu1 %v783_v60, %s2839_s16 }
  0x99   : > { %v599_v12 = vpop.permute.xlu0 %598 }
  0x9a   : > { %v698_v25 = vsel %vm697_vm5, %v3127_v54, %v599_v12 }
  0x9c   : > { %v631_v42 = vpop.permute.xlu1 %630 }
  0x9d   : > { %v617_v41 = vpop.permute.xlu0 %616 }
  0x9e   : > { %v702_v26 = vsel %vm701_vm6, %v698_v25, %v617_v41 }
  0x9f   : > { %v706_v55 = vsel %vm705_vm7, %v702_v26, %v631_v42 }
  0xa0   : > { %v646_v11 = vpop.permute.xlu1 %645 }
  0xa1   : > { %v601_v56 = vpop.permute.xlu0 %600  ;;  %v710_v23 = vsel %vm709_vm8, %v706_v55, %v646_v11 }
  0xa4   : > { %v660_v21 = vpop.permute.xlu1 %659 }
  0xa5   : > { %v619_v37 = vpop.permute.xlu0 %618  ;;  %v714_v59 = vsel %vm713_vm9, %v710_v23, %v660_v21 }
  0xa8   : > { %v675_v58 = vpop.permute.xlu1 %674 }
  0xa9   : > { %v726_v62 = vpop.permute.xlu0 %725  ;;  %v718_v54 = vsel %vm717_vm10, %v714_v59, %v675_v58  ;;  %v699_v58 = vsel %vm697_vm5, %v3137_v57, %v601_v56 }
  0xac   : > { %v633_v60 = vpop.permute.xlu1 %632 }
  0xad   : > { %v689_v61 = vpop.permute.xlu0 %688 }
  0xae   : > { %v722_v12 = vsel %vm721_vm11, %v718_v54, %v689_v61  ;;  %v703_v54 = vsel %vm701_vm6, %v699_v58, %v619_v37  ;;  %v794_v37 = vsel %vm697_vm5, %v3117_v52, %v726_v62 }
  0xaf   : > { %2561 = vmatmul.mubr.msk.f32.vlgmr.msra.gmra.mxu0 %vm825_vm12, %v722_v12  ;;  %v707_v12 = vsel %vm705_vm7, %v703_v54, %v633_v60 }
  0xb0   : > { %v735_v41 = vpop.permute.xlu1 %734  ;;  %2563 = vmatprep.mubr.msk.f32.mxu0 %vm2837_vm3, %v3898_v29 }
  0xb1   : > { %v603_v42 = vpop.permute.xlu0 %602  ;;  %v797_v60 = vsel %vm701_vm6, %v794_v37, %v735_v41 }
  0xb4   : > { %v648_v25 = vpop.permute.xlu1 %647 }
  0xb5   : > { %v744_v26 = vpop.permute.xlu0 %743  ;;  %v711_v13 = vsel %vm709_vm8, %v707_v12, %v648_v25 }
  0xb8   : > { %v621_v11 = vpop.permute.xlu1 %620 }
  0xb9   : > { %v662_v55 = vpop.permute.xlu0 %661 }
  0xba   : > { %v715_v14 = vsel %vm713_vm9, %v711_v13, %v662_v55  ;;  %v800_v13 = vsel %vm705_vm7, %v797_v60, %v744_v26 }
  0xbc   : > { %v753_v27 = vpop.permute.xlu1 %752 }
  0xbd   : > { %v635_v21 = vpop.permute.xlu0 %634  ;;  %v803_v55 = vsel %vm709_vm8, %v800_v13, %v753_v27 }
  0xc0   : > { %v677_v23 = vpop.permute.xlu1 %676 }
  0xc1   : > { %v728_v59 = vpop.permute.xlu0 %727  ;;  %v719_v30 = vsel %vm717_vm10, %v715_v14, %v677_v23 }
  0xc4   : > { %v762_v61 = vpop.permute.xlu1 %761 }
  0xc5   : > { %v650_v28 = vpop.permute.xlu0 %649 }
  0xc8   : > { %v691_v15 = vpop.permute.xlu1 %690 }
  0xc9   : > { %v723_v31 = vsel %vm721_vm11, %v719_v30, %v691_v15  ;;  %v737_v16 = vpop.permute.xlu0 %736  ;;  %v700_v15 = vsel %vm697_vm5, %v3151_v63, %v603_v42  ;;  %v806_v30 = vsel %vm713_vm9, %v803_v55, %v762_v61 }
  0xca   : > { %2564 = vmatmul.mubr.msk.f32.gmra.mxu0 %vm825_vm12, %v723_v31  ;;  %v704_v31 = vsel %vm701_vm6, %v700_v15, %v621_v11 }
  0xcb   : > { %2566 = vmatprep.mubr.msk.f32.mxu0 %vm2837_vm3, %v3898_v29  ;;  %v708_v52 = vsel %vm705_vm7, %v704_v31, %v635_v21 }
  0xcc   : > { %v771_v57 = vpop.permute.xlu1 %770  ;;  %v712_v26 = vsel %vm709_vm8, %v708_v52, %v650_v28 }
  0xcd   : > { %v664_v56 = vpop.permute.xlu0 %663  ;;  %v809_v23 = vsel %vm717_vm10, %v806_v30, %v771_v57  ;;  %v795_v57 = vsel %vm697_vm5, %v3122_v53, %v728_v59 }
  0xce   : > { %v716_v54 = vsel %vm713_vm9, %v712_v26, %v664_v56  ;;  %v798_v21 = vsel %vm701_vm6, %v795_v57, %v737_v16 }
  0xd0   : > { %v746_v25 = vpop.permute.xlu1 %745 }
  0xd1   : > { %v786_v14 = vpop.permute.xlu0 %785  ;;  %v801_v28 = vsel %vm705_vm7, %v798_v21, %v746_v25 }
  0xd2   : > { %v812_v62 = vsel %vm721_vm11, %v809_v23, %v786_v14 }
  0xd3   : > { %v818_v27 = vrot.slane %v812_v62, 4 }
  0xd4   : > { %v679_v58 = vpop.permute.xlu1 %678 }
  0xd5   : > { %v755_v41 = vpop.permute.xlu0 %754  ;;  %v720_v12 = vsel %vm717_vm10, %v716_v54, %v679_v58 }
  0xd6   : > { %v804_v60 = vsel %vm709_vm8, %v801_v28, %v755_v41 }
  0xd8   : > { %v693_v63 = vpop.permute.xlu1 %692 }
  0xd9   : > { %v724_v42 = vsel %vm721_vm11, %v720_v12, %v693_v63  ;;  %v764_v61 = vpop.permute.xlu0 %763 }
  0xda   : > { %v824_v11 = vsel %vm779_vm4, %v724_v42, %v818_v27  ;;  %v807_v13 = vsel %vm713_vm9, %v804_v60, %v764_v61 }
  0xdb   : > { %2567 = vmatmul.mubr.msk.f32.gmra.mxu0 %vm825_vm12, %v824_v11 }
  0xdc   : > { %v773_v37 = vpop.permute.xlu1 %772  ;;  %2569 = vmatprep.mubr.msk.f32.mxu0 %vm2837_vm3, %v3898_v29 }
  0xdd   : > { %v730_v56 = vpop.permute.xlu0 %729  ;;  %v810_v14 = vsel %vm717_vm10, %v807_v13, %v773_v37  ;;  %v944_v37 = vlaneseq }
  0xde   : > { %v796_v53 = vsel %vm697_vm5, %v3192_v38, %v730_v56 }
  0xdf   : > { %v945_v56 = vshrl.u32 %v944_v37, 7 }
  0xe0   : > { %v788_v55 = vpop.permute.xlu1 %787 }
  0xe1   : > { %v813_v59 = vsel %vm721_vm11, %v810_v14, %v788_v55  ;;  %v739_v16 = vpop.permute.xlu0 %738  ;;  %v3395_v60 = vsub.s32 0, %v945_v56 }
  0xe2   : > { %v819_v15 = vrot.slane %v813_v59, 4  ;;  %v799_v30 = vsel %vm701_vm6, %v796_v53, %v739_v16 }
  0xe3   : > { %v947_v53 = vrot.slane %v2950_v0, %v3395_v60 }
  0xe4   : > { %v748_v31 = vpop.permute.xlu1 %747  ;;  %v820_v25 = vsel %vm779_vm4, %v818_v27, %v819_v15 }
  0xe5   : > { %v802_v23 = vsel %vm705_vm7, %v799_v30, %v748_v31  ;;  %2570 = vmatmul.mubr.msk.f32.gmra.mxu0 %vm825_vm12, %v820_v25  ;;  %v757_v58 = vpop.permute.xlu0 %756 }
  0xe6   : > { %2572 = vmatprep.mubr.msk.f32.mxu0 %vm2837_vm3, %v3898_v29  ;;  %v805_v52 = vsel %vm709_vm8, %v802_v23, %v757_v58 }
  0xe8   : > { %v766_v38 = vpop.permute.xlu1 %765 }
  0xe9   : > { %v808_v62 = vsel %vm713_vm9, %v805_v52, %v766_v38  ;;  %v775_v41 = vpop.permute.xlu0 %774 }
  0xea   : > { %v811_v26 = vsel %vm717_vm10, %v808_v62, %v775_v41 }
  0xec   : > { %v790_v54 = vpop.permute.xlu1 %789 }
  0xed   : > { %v814_v12 = vsel %vm721_vm11, %v811_v26, %v790_v54 }
  0xee   : > { %v821_v27 = vrot.slane %v814_v12, 4 }
  0xf0   : > { %v822_v63 = vsel %vm779_vm4, %v819_v15, %v821_v27 }
  0xf1   : > { %2573 = vmatmul.mubr.msk.f32.gmra.mxu0 %vm825_vm12, %v822_v63 }
  0xf2   : > { %2583 = vmatprep.mubr.msk.f32.mxu0 %vm2837_vm3, %v3898_v29 }
 0x16f   : > { %v905_v42 = vpop.f32.mrf.mxu0 }
 0x171   : > { %v2562_v61 = vpop.f32.mrf.mxu0 }
 0x18a   : > { %v910_v11 = vpop.f32.mrf.mxu0 }
 0x18c   : > { %v2565_v57 = vpop.f32.mrf.mxu0 }
 0x19b   : > { %v915_v21 = vpop.f32.mrf.mxu0 }
 0x19c   : > { %v932_v14 = vrot.slane %v915_v21, 4 }
 0x19d   : > { %v2568_v28 = vpop.f32.mrf.mxu0 }
 0x1a5   : > { %v920_v13 = vpop.f32.mrf.mxu0 }
 0x1a6   : > { %v933_v55 = vrot.slane %v920_v13, 4 }
 0x1a7   : > { %v2571_v59 = vpop.f32.mrf.mxu0 }
 0x1a8   : > { %v934_v16 = vsel %vm779_vm4, %v932_v14, %v933_v55 }
 0x1a9   : > { %v940_v15 = vmax.f32 %v905_v42, %v934_v16 }
 0x1ab   : > { %v949_v30 = vadd.f32 %v947_v53, %v940_v15 }
 0x1ad   : > { %v952_v31 = vmax.f32 %v949_v30, 0.0 }
 0x1af   : > { %v956_v25 = vrot.slane %v952_v31, 4 }
 0x1b1   : > { %v3401_v23 = vsel %vm779_vm4, 0.0, %v956_v25  ;;  %v3404_v58 = vsel %vm779_vm4, %v956_v25, 0.0  ;;  %v925_v52 = vpop.f32.mrf.mxu0 }
 0x1b2   : > { %v935_v38 = vrot.slane %v925_v52, 4  ;;  %v985_v62 = vrot.slane %v3401_v23, 2  ;;  %v986_v41 = vrot.slane %v3404_v58, 2  ;;  %v1055_v26 = vrot.slane %v3401_v23, 6 }
 0x1b3   : > { %v2574_v54 = vpop.f32.mrf.mxu0  ;;  %v1056_v12 = vrot.slane %v3404_v58, 6  ;;  %v966_v27 = vrot.slane %v3401_v23, 1  ;;  %v967_v63 = vrot.slane %v3404_v58, 1  ;;  %v1035_v42 = vrot.slane %v3401_v23, 5 }
 0x1b4   : > { %v936_v61 = vsel %vm779_vm4, %v933_v55, %v935_v38  ;;  %v942_v57 = vmax.f32 %v915_v21, %v935_v38  ;;  %v987_v37 = vsel %vm639_vm1, %v985_v62, %v986_v41  ;;  %v1036_v28 = vrot.slane %v3404_v58, 5 }
 0x1b5   : > { %v941_v56 = vmax.f32 %v910_v11, %v936_v61  ;;  %v1057_v13 = vsel %vm1054_vm13, %v1055_v26, %v1056_v12  ;;  %v968_v14 = vsel %vm610_vm0, %v966_v27, %v967_v63  ;;  %v1004_v59 = vrot.slane %v3401_v23, 3 }
 0x1b6   : > { %v951_v16 = vadd.f32 %v947_v53, %v942_v57  ;;  %v2715_v15 = vpack.i.bf16 %v987_v37, %v1057_v13  ;;  %v1037_v30 = vsel %vm1034_vm14, %v1035_v42, %v1036_v28  ;;  %v1005_v31 = vrot.slane %v3404_v58, 3 }
 0x1b7   : > { %v950_v25 = vadd.f32 %v947_v53, %v941_v56  ;;  %v2710_v55 = vpack.i.bf16 %v968_v14, %v1037_v30  ;;  %v1075_v21 = vrot.slane %v3401_v23, 7  ;;  %v1076_v52 = vrot.slane %v3404_v58, 7 }
 0x1b8   : > { %v954_v38 = vmax.f32 %v951_v16, 0.0  ;;  %2716 = vrot.lane.b32.xlu1 %v2715_v15, %s2840_s18  ;;  %v1006_v11 = vsel %vm668_vm2, %v1004_v59, %v1005_v31 }
 0x1b9   : > { %v953_v62 = vmax.f32 %v950_v25, 0.0  ;;  %2711 = vrot.lane.b32.xlu0 %v2710_v55, %s2841_s19  ;;  %v1077_v26 = vsel %vm1074_vm15, %v1075_v21, %v1076_v52 }
 0x1ba   : > { %v3428_v54 = vsel %vm779_vm4, %v954_v38, 0.0  ;;  %v2720_v27 = vpack.i.bf16 %v1006_v11, %v1077_v26 }
 0x1bb   : > { %v3431_v53 = vsel %vm779_vm4, 0.0, %v953_v62  ;;  %v971_v42 = vrot.slane %v3428_v54, 1  ;;  %v1040_v61 = vrot.slane %v3428_v54, 5  ;;  %v1009_v16 = vrot.slane %v3428_v54, 3 }
 0x1bc   : > { %v988_v57 = vrot.slane %v3431_v53, 2  ;;  %v1058_v37 = vrot.slane %v3431_v53, 6  ;;  %v969_v56 = vrot.slane %v3431_v53, 1  ;;  %v1038_v13 = vrot.slane %v3431_v53, 5 }
 0x1bd   : > { %2721 = vrot.lane.b32.xlu0 %v2720_v27, %s2842_s20  ;;  %v1007_v14 = vrot.slane %v3431_v53, 3  ;;  %v1078_v59 = vrot.slane %v3431_v53, 7  ;;  %v1080_v11 = vrot.slane %v3428_v54, 7  ;;  %v990_v62 = vrot.slane %v3428_v54, 2 }
 0x1be   : > { %v989_v15 = vsel %vm639_vm1, %v986_v41, %v988_v57  ;;  %v1059_v30 = vsel %vm1054_vm13, %v1056_v12, %v1058_v37  ;;  %v970_v25 = vsel %vm610_vm0, %v967_v63, %v969_v56  ;;  %v1039_v55 = vsel %vm1034_vm14, %v1036_v28, %v1038_v13 }
 0x1bf   : > { %v2730_v21 = vpack.i.bf16 %v989_v15, %v1059_v30  ;;  %v2725_v38 = vpack.i.bf16 %v970_v25, %v1039_v55  ;;  %v972_v26 = vsel %vm610_vm0, %v969_v56, %v971_v42  ;;  %v1041_v27 = vsel %vm1034_vm14, %v1038_v13, %v1040_v61 }
 0x1c0   : > { %v1008_v0 = vsel %vm668_vm2, %v1005_v31, %v1007_v14  ;;  %v1079_v41 = vsel %vm1074_vm15, %v1076_v52, %v1078_v59  ;;  %v1060_v12 = vrot.slane %v3428_v54, 6  ;;  %v2740_v63 = vpack.i.bf16 %v972_v26, %v1041_v27 }
 0x1c1   : > { %2731 = vrot.lane.b32.xlu0 %v2730_v21, %s2840_s18  ;;  %2726 = vrot.lane.b32.xlu1 %v2725_v38, %s2841_s19  ;;  %v2735_v28 = vpack.i.bf16 %v1008_v0, %v1079_v41  ;;  %v1010_v15 = vsel %vm668_vm2, %v1007_v14, %v1009_v16  ;;  %v1081_v30 = vsel %vm1074_vm15, %v1078_v59, %v1080_v11  ;;  %vm1094_vm0 = vcmask 261120  }
 0x1c2   : > { %v991_v56 = vsel %vm639_vm1, %v988_v57, %v990_v62  ;;  %v1061_v13 = vsel %vm1054_vm13, %v1058_v37, %v1060_v12  ;;  %v2755_v31 = vpack.i.bf16 %v1010_v15, %v1081_v30  ;;  %v2760_v25 = vpack.i.bf16 %v990_v62, %v1060_v12 }
 0x1c3   : > { %v2745_v52 = vpack.i.bf16 %v991_v56, %v1061_v13  ;;  %v2750_v0 = vpack.i.bf16 %v971_v42, %v1040_v61  ;;  %v2765_v14 = vpack.i.bf16 %v1009_v16, %v1080_v11  ;;  %v1023_v57 = vrot.slane %v3401_v23, 4 }
 0x1c4   : > { %v1024_v37 = vrot.slane %v3404_v58, 4  ;;  %vm1099_vm1 = vcmask 523264   ;;  %vm1104_vm2 = vcmask 785408  }
 0x1c5   : > { %2741 = vrot.lane.b32.xlu0 %v2740_v63, %s2841_s19  ;;  %2736 = vrot.lane.b32.xlu1 %v2735_v28, %s2842_s20  ;;  %v1026_v28 = vrot.slane %v3431_v53, 4 }
 0x1c6   : > { %v1025_v42 = vsel %vm779_vm4, %v1023_v57, %v1024_v37 }
 0x1c9   : > { %2756 = vrot.lane.b32.xlu0 %v2755_v31, %s2842_s20  ;;  %2746 = vrot.lane.b32.xlu1 %v2745_v52, %s2840_s18 }
 0x1cd   : > { %2761 = vrot.lane.b32.xlu0 %v2760_v25, %s2840_s18  ;;  %2751 = vrot.lane.b32.xlu1 %v2750_v0, %s2841_s19  ;;  %v1027_v0 = vsel %vm779_vm4, %v1024_v37, %v1026_v28 }
 0x1d1   : > { %2766 = vrot.lane.b32.xlu1 %v2765_v14, %s2842_s20 }
 0x22a   : > { %v2717_v59 = vpop.permute.xlu1 %2716 }
 0x22b   : > { %v2712_v55 = vpop.permute.xlu0 %2711  ;;  %v2719_v26 = vunpack.i.h.bf16 %v2717_v59  ;;  %v2718_v27 = vunpack.i.l.bf16 %v2717_v59 }
 0x22c   : > { %v2714_v21 = vunpack.i.h.bf16 %v2712_v55  ;;  %v2713_v38 = vunpack.i.l.bf16 %v2712_v55 }
 0x22e   : > { %v1109_v61 = vsel %vm1094_vm0, %v1025_v42, %v2713_v38  ;;  %v1095_v16 = vsel %vm1094_vm0, %v3401_v23, %v2714_v21  ;;  %v1028_v21 = vrot.slane %v3428_v54, 4 }
 0x22f   : > { %v2722_v11 = vpop.permute.xlu0 %2721  ;;  %v1113_v12 = vsel %vm1099_vm1, %v1109_v61, %v2718_v27  ;;  %v1100_v63 = vsel %vm1099_vm1, %v1095_v16, %v2719_v26 }
 0x230   : > { %v2724_v62 = vunpack.i.h.bf16 %v2722_v11  ;;  %v2723_v41 = vunpack.i.l.bf16 %v2722_v11 }
 0x232   : > { %v1117_v15 = vsel %vm1104_vm2, %v1113_v12, %v2723_v41  ;;  %v1105_v30 = vsel %vm1104_vm2, %v1100_v63, %v2724_v62  ;;  %v1029_v41 = vsel %vm779_vm4, %v1026_v28, %v1028_v21  ;;  %vm1372_vm4 = vcmask 517120  }
 0x233   : > { %1191 = vmatprep.mubr.f32.mxu1 %v1117_v15  ;;  %v2727_v56 = vpop.permute.xlu1 %2726  ;;  %v2732_v13 = vpop.permute.xlu0 %2731 }
 0x234   : > { %1192 = vmatmul.mubr.f32.vlgmr.msra.gmra.mxu1 %v1105_v30  ;;  %v2729_v31 = vunpack.i.h.bf16 %v2727_v56  ;;  %v2728_v23 = vunpack.i.l.bf16 %v2727_v56  ;;  %v2734_v52 = vunpack.i.h.bf16 %v2732_v13  ;;  %v2733_v25 = vunpack.i.l.bf16 %v2732_v13 }
 0x235   : > { %2587 = vmatpush3.msra.mxu1 %v3109_v50 }
 0x236   : > { %v1110_v14 = vsel %vm1094_vm0, %v1027_v0, %v2728_v23  ;;  %v1096_v57 = vsel %vm1094_vm0, %v3404_v58, %v2729_v31  ;;  %2588 = vmatprep.subr.mxu1 %v3898_v29 }
 0x237   : > { %v2737_v59 = vpop.permute.xlu1 %2736  ;;  %v2742_v55 = vpop.permute.xlu0 %2741  ;;  %2589 = vmatpush3.msra.mxu1 %v3107_v49  ;;  %v1114_v42 = vsel %vm1099_vm1, %v1110_v14, %v2733_v25  ;;  %v1101_v61 = vsel %vm1099_vm1, %v1096_v57, %v2734_v52 }
 0x238   : > { %v2739_v38 = vunpack.i.h.bf16 %v2737_v59  ;;  %v2738_v26 = vunpack.i.l.bf16 %v2737_v59  ;;  %2590 = vmatprep.subr.mxu1 %v3898_v29  ;;  %v2744_v37 = vunpack.i.h.bf16 %v2742_v55  ;;  %v2743_v27 = vunpack.i.l.bf16 %v2742_v55 }
 0x239   : > { %2591 = vmatpush3.msra.mxu1 %v3105_v48 }
 0x23a   : > { %v1118_v58 = vsel %vm1104_vm2, %v1114_v42, %v2738_v26  ;;  %v1106_v16 = vsel %vm1104_vm2, %v1101_v61, %v2739_v38  ;;  %2592 = vmatprep.subr.mxu1 %v3898_v29  ;;  %v1111_v56 = vsel %vm1094_vm0, %v1029_v41, %v2743_v27  ;;  %v1097_v13 = vsel %vm1094_vm0, %v3431_v53, %v2744_v37 }
 0x23b   : > { %v2747_v11 = vpop.permute.xlu1 %2746  ;;  %v2757_v62 = vpop.permute.xlu0 %2756  ;;  %1196 = vmatprep.mubr.f32.mxu1 %v1118_v58  ;;  %2593 = vmatpush3.msra.mxu1 %v3103_v47 }
 0x23c   : > { %v2749_v12 = vunpack.i.h.bf16 %v2747_v11  ;;  %v2748_v63 = vunpack.i.l.bf16 %v2747_v11  ;;  %v2759_v15 = vunpack.i.h.bf16 %v2757_v62  ;;  %v2758_v30 = vunpack.i.l.bf16 %v2757_v62  ;;  %1197 = vmatmul.mubr.f32.gmra.mxu1 %v1106_v16  ;;  %2594 = vmatprep.subr.mxu1 %v3898_v29 }
 0x23d   : > { %2595 = vmatpush3.msra.mxu1 %v3101_v46 }
 0x23e   : > { %v1115_v31 = vsel %vm1099_vm1, %v1111_v56, %v2748_v63  ;;  %v1102_v28 = vsel %vm1099_vm1, %v1097_v13, %v2749_v12  ;;  %2596 = vmatprep.subr.mxu1 %v3898_v29  ;;  %v1125_v56 = vrot.slane %v2955_v1, %v3395_v60 }
 0x23f   : > { %v2752_v23 = vpop.permute.xlu1 %2751  ;;  %v2762_v52 = vpop.permute.xlu0 %2761  ;;  %v1119_v25 = vsel %vm1104_vm2, %v1115_v31, %v2758_v30  ;;  %v1107_v0 = vsel %vm1104_vm2, %v1102_v28, %v2759_v15  ;;  %2597 = vmatpush3.msra.mxu1 %v3099_v45 }
 0x240   : > { %v2754_v14 = vunpack.i.h.bf16 %v2752_v23  ;;  %v2753_v57 = vunpack.i.l.bf16 %v2752_v23  ;;  %1201 = vmatprep.mubr.f32.mxu1 %v1119_v25  ;;  %2598 = vmatprep.subr.mxu1 %v3898_v29  ;;  %v2764_v53 = vunpack.i.h.bf16 %v2762_v52  ;;  %v2763_v59 = vunpack.i.l.bf16 %v2762_v52 }
 0x241   : > { %1202 = vmatmul.mubr.f32.gmra.mxu1 %v1107_v0 }
 0x242   : > { %v1112_v55 = vsel %vm1094_vm0, %v1028_v21, %v2753_v57  ;;  %v1098_v38 = vsel %vm1094_vm0, %v3428_v54, %v2754_v14  ;;  %2599 = vmatpush3.msra.mxu1 %v3097_v44 }
 0x243   : > { %v2767_v26 = vpop.permute.xlu1 %2766  ;;  %2600 = vmatprep.subr.mxu1 %v3898_v29  ;;  %v1116_v42 = vsel %vm1099_vm1, %v1112_v55, %v2763_v59  ;;  %v1103_v61 = vsel %vm1099_vm1, %v1098_v38, %v2764_v53  ;;  %v594_v55 = vld [vmem:[%s3845_s10] sm:$0x3] }
 0x244   : > { %v2769_v37 = vunpack.i.h.bf16 %v2767_v26  ;;  %v2768_v27 = vunpack.i.l.bf16 %v2767_v26  ;;  %2601 = vmatpush3.msra.mxu1 %v3095_v43 }
 0x246   : > { %v1120_v58 = vsel %vm1104_vm2, %v1116_v42, %v2768_v27  ;;  %v1108_v21 = vsel %vm1104_vm2, %v1103_v61, %v2769_v37  ;;  %v1297_v37 = vrot.slane %v3111_v51, %v3395_v60 }
 0x247   : > { %1206 = vmatprep.mubr.f32.mxu1 %v1120_v58 }
 0x248   : > { %1207 = vmatmul.mubr.f32.gmra.mxu1 %v1108_v21 }
 0x249   : > { %2602 = vmatprep.mubr.msk.f32.mxu1 %vm2837_vm3, %v3898_v29  ;;  %vm1216_vm3 = vcmask 203776  }
 0x2f4   : > { %v2442_v54 = vpop.f32.mrf.mxu1 }
 0x2f6   : > { %v2443_v16 = vpop.f32.mrf.mxu1 }
 0x2f7   : > { %v2444_v28 = vadd.f32 %v2443_v16, %v2442_v54 }
 0x2f9   : > { %v1194_v14 = vadd.f32 %v2444_v28, %v1125_v56 }
 0x2fb   : > { %v1212_v59 = vmax.f32 %v1194_v14, 0.0 }
 0x2fc   : > { %v2445_v11 = vpop.f32.mrf.mxu1 }
 0x2fe   : > { %v2446_v62 = vpop.f32.mrf.mxu1 }
 0x2ff   : > { %v2447_v13 = vadd.f32 %v2446_v62, %v2445_v11 }
 0x301   : > { %v2448_v41 = vpop.f32.mrf.mxu1  ;;  %v1199_v25 = vadd.f32 %v2447_v13, %v1125_v56 }
 0x303   : > { %v2449_v12 = vpop.f32.mrf.mxu1  ;;  %v1213_v53 = vmax.f32 %v1199_v25, 0.0 }
 0x304   : > { %v2450_v15 = vadd.f32 %v2449_v12, %v2448_v41 }
 0x306   : > { %v1204_v23 = vadd.f32 %v2450_v15, %v1125_v56 }
 0x308   : > { %v2451_v63 = vpop.f32.mrf.mxu1  ;;  %v1214_v57 = vmax.f32 %v1204_v23, 0.0 }
 0x30a   : > { %v2452_v30 = vpop.f32.mrf.mxu1 }
 0x30b   : > { %v2453_v31 = vadd.f32 %v2452_v30, %v2451_v63 }
 0x30d   : > { %v1209_v52 = vadd.f32 %v2453_v31, %v1125_v56 }
 0x30f   : > { %v1215_v0 = vmax.f32 %v1209_v52, 0.0 }
 0x311   : > { %2576 = vmatpush3.msk.msra.mxu0 %vm1074_vm15, %v1215_v0 }
 0x312   : > { %2577 = vmatprep.subr.mxu0 %v3898_v29 }
 0x313   : > { %2578 = vmatpush3.msra.mxu0 %v1214_v57 }
 0x314   : > { %2579 = vmatprep.subr.mxu0 %v3898_v29 }
 0x315   : > { %2580 = vmatpush3.msra.mxu0 %v1213_v53 }
 0x316   : > { %2581 = vmatprep.subr.mxu0 %v3898_v29 }
 0x317   : > { %2582 = vmatpush3.msra.mxu0 %v1212_v59 }
 0x318   : > { %2584 = vmatmul.mubr.msk.f32.vlgmr.msra.gmra.mxu0 %vm1216_vm3, %v594_v55 }
 0x3d8   : > { %v1289_v38 = vpop.f32.mrf.mxu0 }
 0x3d9   : > { %1373 = vst.msk [vmem:[%s2978_s14] sm:$0x3] %vm1372_vm4, %v1289_v38  ;;  %2603 = vmatmul.mubr.msk.f32.vlgmr.msra.gmra.mxu1 %vm1099_vm1, %v1289_v38 }
 0x3da   : > { %v2585_v26 = vpop.f32.mrf.mxu0 }
 0x499   : > { %v1368_v27 = vpop.f32.mrf.mxu1 }
 0x49a   : > { %v1369_v42 = vadd.f32 %v1368_v27, %v1297_v37 }
 0x49b   : > { %v2604_v61 = vpop.f32.mrf.mxu1 }
 0x49c   : > { %1374 = vst.msk [vmem:[%s2983_s17] sm:$0x3] %vm1372_vm4, %v1369_v42 }
 0x49d PF: > { %p2379_p5 = scmp.ne.s32.totalorder %s2932_s26, 1 }
 0x49e   : > { %s2845_s23 = smov (!%p2379_p5), 119   ;;  %s2846_s28 = smov (!%p2379_p5), 9  }
 0x49f   : > { %1378 = sbr.rel (%p2379_p5) target bundleno = 2661 (0xa65), region = 76  ;;  %s2847_s27 = smov (!%p2379_p5), 18  }
 0x4a0   : > { %s2848_s24 = smov (!%p2379_p5), 36   ;;  %s2849_s26 = smov (!%p2379_p5), 27  }
 0x4a1   : > { %s2850_s29 = smov (!%p2379_p5), 45   ;;  %s2851_s30 = smov (!%p2379_p5), 63  }
 0x4a2   : > { %s2852_s15 = smov (!%p2379_p5), 54   ;;  %s2853_s16 = smov (!%p2379_p5), 64  }
 0x4a3   : > { %s2854_s18 = smov (!%p2379_p5), 32   ;;  %s2855_s19 = smov (!%p2379_p5), 96  }
 0x4a4   : > { %v1385_v29 = vld [vmem:[%s3843_s8 + $0x8] sm:$0xff]  ;;  %2624 = vmatprep.subr.mxu1 %v2989_v10  ;;  %v2843_v58 = vmov 0.0   ;;  %v1384_v60 = vld [vmem:[%s3843_s8] sm:$0xff]  ;;  %vm2844_vm5 = vmmov 0   ;;  %vm1386_vm6 = vcmask 130048   ;;  %v1381_v16 = vld [vmem:[%s3844_s9 + $0x10] sm:$0xff] }
 0x4a5   : > { %2605 = vmatprep.subr.mxu0 %v2843_v58  ;;  %2609 = vmatprep.mubr.msk.f32.mxu0 %vm2844_vm5, %v2843_v58  ;;  %v1379_v21 = vld [vmem:[%s3844_s9] sm:$0xff]  ;;  %v1380_v54 = vld [vmem:[%s3844_s9 + $0x8] sm:$0xff]  ;;  %v1382_v11 = vld [vmem:[%s3844_s9 + $0x18] sm:$0xff]  ;;  %vm1498_vm7 = vcmask 1045504   ;;  %vm1544_vm12 = vcmask 1040384   ;;  %vm1556_vm1 = vcmask 1046528  }
 0x4a6   : > { %2606 = vmatpush3.msra.mxu0 %v1385_v29  ;;  %2625 = vmatpush3.msra.mxu1 %v2989_v10  ;;  %v3900_v10 = vld [vmem:[#allocation21_spill] sm:$0xff]  ;;  %vm1613_vm2 = vcmask 1044480   ;;  %vm1693_vm3 = vcmask 1043456   ;;  %vm1636_vm4 = vcmask 72704  }
 0x4a7   : > { %2607 = vmatprep.subr.mxu0 %v2843_v58  ;;  %2626 = vmatprep.subr.mxu1 %v2987_v9 }
 0x4a8   : > { %2608 = vmatpush3.msra.mxu0 %v1384_v60  ;;  %2627 = vmatpush3.msra.mxu1 %v2987_v9  ;;  %v3901_v9 = vld [vmem:[#allocation12_spill] sm:$0xff] }
 0x4a9   : > { %2610 = vmatmul.mubr.msk.f32.vlgmr.msra.gmra.mxu0 %vm1386_vm6, %v1379_v21  ;;  %2628 = vmatprep.subr.mxu1 %v2985_v8 }
 0x4aa   : > { %2612 = vmatprep.mubr.msk.f32.mxu0 %vm2844_vm5, %v2843_v58  ;;  %2629 = vmatpush3.msra.mxu1 %v2985_v8  ;;  %v3902_v8 = vld [vmem:[#allocation20_spill] sm:$0xff] }
 0x4ab   : > { %2630 = vmatprep.subr.mxu1 %v2973_v7  ;;  %2488 = vmatprep.subr.mxu0 %v3900_v10 }
 0x4ac   : > { %2631 = vmatpush3.msra.mxu1 %v2973_v7  ;;  %2489 = vmatpush3.msra.mxu0 %v3901_v9  ;;  %v3903_v7 = vld [vmem:[#allocation11_spill] sm:$0xff] }
 0x4ad   : > { %2613 = vmatmul.mubr.msk.f32.gmra.mxu0 %vm1386_vm6, %v1380_v54  ;;  %2632 = vmatprep.subr.mxu1 %v2971_v6 }
 0x4ae   : > { %2615 = vmatprep.mubr.msk.f32.mxu0 %vm2844_vm5, %v2843_v58  ;;  %2633 = vmatpush3.msra.mxu1 %v2971_v6  ;;  %v3906_v6 = vld [vmem:[#allocation18_spill] sm:$0xff] }
 0x4af   : > { %2634 = vmatprep.subr.mxu1 %v2969_v5  ;;  %2490 = vmatprep.subr.mxu0 %v3902_v8 }
 0x4b0   : > { %2635 = vmatpush3.msra.mxu1 %v2969_v5  ;;  %2491 = vmatpush3.msra.mxu0 %v3903_v7  ;;  %v1383_v5 = vld [vmem:[%s3844_s9 + $0x20] sm:$0xf] }
 0x4b1   : > { %2616 = vmatmul.mubr.msk.f32.gmra.mxu0 %vm1386_vm6, %v1381_v16  ;;  %2636 = vmatprep.subr.mxu1 %v2966_v4 }
 0x4b2   : > { %2618 = vmatprep.mubr.msk.f32.mxu0 %vm2844_vm5, %v2843_v58  ;;  %2637 = vmatpush3.msra.mxu1 %v2966_v4  ;;  %v3905_v4 = vld [vmem:[#allocation19_spill] sm:$0xff] }
 0x4b3   : > { %2638 = vmatprep.subr.mxu1 %v2964_v3  ;;  %2492 = vmatprep.subr.mxu0 %v3083_v40 }
 0x4b4   : > { %2639 = vmatpush3.msra.mxu1 %v2964_v3  ;;  %2493 = vmatpush3.msra.mxu0 %v3032_v24  ;;  %v3904_v3 = vld [vmem:[#allocation10_spill] sm:$0xff]  ;;  %v3907_v24 = vld [vmem:[#allocation9_spill] sm:$0xff] }
 0x4b5   : > { %2619 = vmatmul.mubr.msk.f32.gmra.mxu0 %vm1386_vm6, %v1382_v11  ;;  %2640 = vmatprep.subr.mxu1 %v2962_v2 }
 0x4b6   : > { %2621 = vmatprep.mubr.msk.f32.mxu0 %vm2844_vm5, %v2843_v58  ;;  %2641 = vmatpush3.msra.mxu1 %v2962_v2  ;;  %v3908_v2 = vld [vmem:[#allocation8_spill] sm:$0xff] }
 0x4b7   : > { %2494 = vmatprep.subr.mxu0 %v3080_v39  ;;  %2648 = vmatprep.subr.mxu1 %v2843_v58 }
 0x4b8   : > { %2495 = vmatpush3.msra.mxu0 %v3904_v3 }
 0x4b9   : > { %2622 = vmatmul.mubr.msk.f32.gmra.mxu0 %vm1386_vm6, %v1383_v5  ;;  %2496 = vmatprep.subr.mxu0 %v3905_v4  ;;  %vm1639_vm6 = vcmask 146432  }
 0x4ba   : > { %2497 = vmatpush3.msra.mxu0 %v3025_v22  ;;  %v3909_v22 = vld [vmem:[#allocation17_spill] sm:$0xff] }
 0x4bb   : > { %2498 = vmatprep.subr.mxu0 %v3906_v6 }
 0x4bc   : > { %2499 = vmatpush3.msra.mxu0 %v3907_v24 }
 0x4bd   : > { %2500 = vmatprep.subr.mxu0 %v3071_v36  ;;  %v3910_v36 = vld [vmem:[#allocation7_spill] sm:$0xff] }
 0x4be   : > { %2501 = vmatpush3.msra.mxu0 %v3019_v20  ;;  %v3911_v20 = vld [vmem:[#allocation16_spill] sm:$0xff] }
 0x4bf   : > { %2502 = vmatprep.subr.mxu0 %v3068_v35  ;;  %v3912_v35 = vld [vmem:[#allocation6_spill] sm:$0xff] }
 0x4c0   : > { %2503 = vmatpush3.msra.mxu0 %v3016_v19  ;;  %v3913_v19 = vld [vmem:[#allocation15_spill] sm:$0xff] }
 0x4c1   : > { %2504 = vmatprep.subr.mxu0 %v3065_v34  ;;  %v3914_v34 = vld [vmem:[#allocation5_spill] sm:$0xff] }
 0x4c2   : > { %2505 = vmatpush3.msra.mxu0 %v3013_v18  ;;  %v3915_v18 = vld [vmem:[#allocation14_spill] sm:$0xff] }
 0x4c3   : > { %2506 = vmatprep.subr.mxu0 %v3062_v33  ;;  %v3916_v33 = vld [vmem:[#allocation4_spill] sm:$0xff] }
 0x4c4   : > { %2507 = vmatpush3.msra.mxu0 %v3010_v17  ;;  %v3917_v17 = vld [vmem:[#allocation13_spill] sm:$0xff] }
 0x4c5   : > { %2508 = vmatprep.subr.mxu0 %v3059_v32  ;;  %v3918_v32 = vld [vmem:[#allocation3_spill] sm:$0xff] }
 0x4c6   : > { %2509 = vmatpush3.msra.mxu0 %v3908_v2 }
 0x4c7   : > { %2510 = vmatprep.subr.mxu0 %v3909_v22 }
 0x4c8   : > { %2511 = vmatpush3.msra.mxu0 %v3910_v36 }
 0x4c9   : > { %2512 = vmatprep.subr.mxu0 %v3911_v20 }
 0x4ca   : > { %2513 = vmatpush3.msra.mxu0 %v3912_v35 }
 0x4cb   : > { %2514 = vmatprep.subr.mxu0 %v3913_v19 }
 0x4cc   : > { %2515 = vmatpush3.msra.mxu0 %v3914_v34 }
 0x4cd   : > { %2516 = vmatprep.subr.mxu0 %v3915_v18 }
 0x4ce   : > { %2517 = vmatpush3.msra.mxu0 %v3916_v33 }
 0x4cf   : > { %2518 = vmatprep.subr.mxu0 %v3917_v17 }
 0x4d0   : > { %2519 = vmatpush3.msra.mxu0 %v3918_v32 }
 0x569   : > { %v1468_v39 = vpop.f32.mrf.mxu0 }
 0x56a   : > { %v1492_v52 = vmul.f32 %v1468_v39, %v1468_v39 }
 0x56b   : > { %v2611_v40 = vpop.f32.mrf.mxu0 }
 0x56d   : > { %v1473_v62 = vpop.f32.mrf.mxu0 }
 0x56e   : > { %v1493_v31 = vmul.f32 %v1473_v62, %v1473_v62 }
 0x56f   : > { %v2614_v41 = vpop.f32.mrf.mxu0 }
 0x571   : > { %v1478_v12 = vpop.f32.mrf.mxu0 }
 0x572   : > { %v1494_v15 = vmul.f32 %v1478_v12, %v1478_v12 }
 0x573   : > { %v2617_v63 = vpop.f32.mrf.mxu0 }
 0x574   : > { %v1499_v28 = vrot.slane %v1494_v15, 2 }
 0x575   : > { %v1483_v30 = vpop.f32.mrf.mxu0 }
 0x576   : > { %v1495_v56 = vmul.f32 %v1483_v30, %v1483_v30 }
 0x577   : > { %v2620_v13 = vpop.f32.mrf.mxu0 }
 0x578   : > { %v1500_v23 = vrot.slane %v1495_v56, 2 }
 0x579   : > { %v1488_v25 = vpop.f32.mrf.mxu0 }
 0x57a   : > { %v1501_v0 = vsel %vm1498_vm7, %v1499_v28, %v1500_v23  ;;  %v1505_v14 = vadd.f32 %v1500_v23, %v1493_v31  ;;  %v1520_v57 = vmul.f32 %v1488_v25, %v1488_v25 }
 0x57b   : > { %v1504_v53 = vadd.f32 %v1501_v0, %v1492_v52  ;;  %v2623_v59 = vpop.f32.mrf.mxu0 }
 0x57c   : > { %2815 = vrsqrt.f32 %v1505_v14  ;;  %v1522_v55 = vrot.slane %v1520_v57, 2  ;;  %vm1515_vm8 = vcmp.eq.f32.partialorder %v1505_v14, inf  ;;  %v1518_v60 = vand.u32 2147483648, %v1505_v14 }
 0x57d   : > { %2817 = vrsqrt.f32 %v1504_v53  ;;  %vm1508_vm9 = vcmp.eq.f32.partialorder %v1504_v53, inf  ;;  %v1511_v21 = vand.u32 2147483648, %v1504_v53  ;;  %vm1517_vm10 = vcmp.eq.f32.partialorder %v1505_v14, 0.0 }
 0x57e   : > { %v1523_v38 = vsel %vm1498_vm7, %v1500_v23, %v1522_v55  ;;  %v1527_v26 = vadd.f32 %v1522_v55, %v1494_v15  ;;  %vm1510_vm11 = vcmp.eq.f32.partialorder %v1504_v53, 0.0 }
 0x57f   : > { %v1526_v37 = vadd.f32 %v1523_v38, %v1493_v31 }
 0x580   : > { %2819 = vrsqrt.f32 %v1527_v26  ;;  %vm1537_vm13 = vcmp.eq.f32.partialorder %v1527_v26, inf  ;;  %v1540_v6 = vand.u32 2147483648, %v1527_v26  ;;  %vm1539_vm15 = vcmp.eq.f32.partialorder %v1527_v26, 0.0 }
 0x581   : > { %2821 = vrsqrt.f32 %v1526_v37  ;;  %vm1530_vm14 = vcmp.eq.f32.partialorder %v1526_v37, inf  ;;  %v1533_v24 = vand.u32 2147483648, %v1526_v37  ;;  %vm1532_vm0 = vcmp.eq.f32.partialorder %v1526_v37, 0.0 }
 0x589   : > { %v2816_v27 = vpop.eup %2815 }
 0x58a   : > { %v2818_v42 = vpop.eup %2817  ;;  %v1514_v61 = vmul.f32 %v2816_v27, %v1505_v14 }
 0x58b   : > { %v1507_v29 = vmul.f32 %v2818_v42, %v1504_v53 }
 0x58c   : > { %v1516_v54 = vsel %vm1515_vm8, %v1505_v14, %v1514_v61  ;;  %vm1642_vm8 = vcmask 220160  }
 0x58d   : > { %v2820_v10 = vpop.eup %2819  ;;  %v1509_v9 = vsel %vm1508_vm9, %v1504_v53, %v1507_v29  ;;  %v1519_v16 = vsel %vm1517_vm10, %v1518_v60, %v1516_v54  ;;  %vm1645_vm9 = vcmask 293888   ;;  %vm1648_vm10 = vcmask 367616  }
 0x58e   : > { %v2822_v8 = vpop.eup %2821  ;;  %v3625_v7 = vsel %vm1510_vm11, %v1511_v21, %v1509_v9  ;;  %v1546_v11 = vrot.slane %v1519_v16, 7  ;;  %v1536_v5 = vmul.f32 %v2820_v10, %v1527_v26  ;;  %vm1651_vm11 = vcmask 441344  }
 0x58f   : > { %v1545_v3 = vrot.slane %v3625_v7, 7  ;;  %v1529_v4 = vmul.f32 %v2822_v8, %v1526_v37  ;;  %v1577_v41 = vrot.slane %v3625_v7, 1  ;;  %v1595_v63 = vrot.slane %v3625_v7, 2 }
 0x590   : > { %v1538_v2 = vsel %vm1537_vm13, %v1527_v26, %v1536_v5  ;;  %v1614_v56 = vrot.slane %v3625_v7, 3  ;;  %v1694_v23 = vrot.slane %v3625_v7, 4  ;;  %vm1654_vm13 = vcmask 515072  }
 0x591   : > { %1548 = vrot.lane.b32.xlu0 %v1545_v3, %s2845_s23  ;;  %v1547_v22 = vsel %vm1544_vm12, %v1545_v3, %v1546_v11  ;;  %v1531_v36 = vsel %vm1530_vm14, %v1526_v37, %v1529_v4  ;;  %v1541_v20 = vsel %vm1539_vm15, %v1540_v6, %v1538_v2  ;;  %vm1726_vm14 = vcmask 588800  }
 0x592   : > { %1550 = vrot.lane.b32.xlu1 %v1547_v22, %s2845_s23  ;;  %v1534_v35 = vsel %vm1532_vm0, %v1533_v24, %v1531_v36  ;;  %v1558_v34 = vrot.slane %v1541_v20, 1  ;;  %vm1825_vm15 = vcmask 1041408   ;;  %vm1906_vm0 = vcmask 1042432  }
 0x593   : > { %v1557_v19 = vrot.slane %v1534_v35, 1 }
 0x595   : > { %1562 = vrot.lane.b32.xlu0 %v1534_v35, %s2845_s23  ;;  %v3630_v18 = vsel %vm1556_vm1, %v1557_v19, %v1558_v34 }
 0x596   : > { %1564 = vrot.lane.b32.xlu1 %v1541_v20, %s2845_s23  ;;  %v1604_v53 = vrot.slane %v3630_v18, 2  ;;  %v1586_v55 = vrot.slane %v3630_v18, 1  ;;  %v1625_v37 = vrot.slane %v3630_v18, 3 }
 0x599   : > { %1570 = vrot.lane.b32.xlu0 %v3630_v18, %s2846_s28 }
 0x603   : > { %v1549_v33 = vpop.permute.xlu0 %1548 }
 0x604   : > { %v3634_v17 = vsel %vm1544_vm12, %v1519_v16, %v1549_v33  ;;  %v1551_v28 = vpop.permute.xlu1 %1550 }
 0x605   : > { %v1578_v32 = vrot.slane %v3634_v17, 1  ;;  %v1596_v62 = vrot.slane %v3634_v17, 2  ;;  %v1615_v30 = vrot.slane %v3634_v17, 3  ;;  %v1695_v31 = vrot.slane %v3634_v17, 4 }
 0x606   : > { %v1617_v52 = vrot.slane %v1551_v28, 3  ;;  %v1697_v60 = vrot.slane %v1551_v28, 4 }
 0x607   : > { %v1563_v39 = vpop.permute.xlu0 %1562  ;;  %1582 = vrot.lane.b32.xlu0 %v1578_v32, %s2847_s27  ;;  %v1579_v12 = vsel %vm1556_vm1, %v1577_v41, %v1578_v32  ;;  %v1597_v15 = vsel %vm1498_vm7, %v1595_v63, %v1596_v62  ;;  %v1616_v13 = vsel %vm1613_vm2, %v1614_v56, %v1615_v30  ;;  %v1696_v25 = vsel %vm1693_vm3, %v1694_v23, %v1695_v31 }
 0x608   : > { %v3639_v40 = vsel %vm1544_vm12, %v1558_v34, %v1563_v39  ;;  %v1618_v0 = vsel %vm1613_vm2, %v1615_v30, %v1617_v52  ;;  %v1565_v42 = vpop.permute.xlu1 %1564  ;;  %v1698_v21 = vsel %vm1693_vm3, %v1695_v31, %v1697_v60 }
 0x609   : > { %1572 = vrot.lane.b32.xlu1 %v3639_v40, %s2846_s28  ;;  %v1587_v14 = vrot.slane %v3639_v40, 1  ;;  %v1605_v57 = vrot.slane %v3639_v40, 2  ;;  %v1626_v38 = vrot.slane %v3639_v40, 3  ;;  %v1628_v61 = vrot.slane %v1565_v42, 3 }
 0x60b   : > { %1600 = vrot.lane.b32.xlu0 %v1596_v62, %s2848_s24  ;;  %v1606_v59 = vsel %vm1498_vm7, %v1604_v53, %v1605_v57  ;;  %v1588_v26 = vsel %vm1556_vm1, %v1586_v55, %v1587_v14  ;;  %v1627_v27 = vsel %vm1613_vm2, %v1625_v37, %v1626_v38  ;;  %v1629_v29 = vsel %vm1613_vm2, %v1626_v38, %v1628_v61  ;;  %v1571_v54 = vpop.permute.xlu0 %1570 }
 0x60c   : > { %v1637_v30 = vsel %vm1636_vm4, %v3625_v7, %v1571_v54 }
 0x60d   : > { %1659 = vrot.lane.b32.xlu1 %v1578_v32, %s2846_s28 }
 0x60f   : > { %1657 = vrot.lane.b32.xlu0 %v1579_v12, %s2846_s28 }
 0x611   : > { %1671 = vrot.lane.b32.xlu1 %v1596_v62, %s2849_s26 }
 0x613   : > { %1669 = vrot.lane.b32.xlu0 %v1597_v15, %s2849_s26 }
 0x615   : > { %1580 = vrot.lane.b32.xlu1 %v1579_v12, %s2847_s27 }
 0x617   : > { %1681 = vrot.lane.b32.xlu0 %v1616_v13, %s2850_s29 }
 0x619   : > { %1598 = vrot.lane.b32.xlu1 %v1597_v15, %s2848_s24 }
 0x61b   : > { %1699 = vrot.lane.b32.xlu0 %v1696_v25, %s2851_s30 }
 0x61d   : > { %1619 = vrot.lane.b32.xlu1 %v1616_v13, %s2852_s15 }
 0x61f   : > { %1621 = vrot.lane.b32.xlu0 %v1618_v0, %s2852_s15 }
 0x621   : > { %1683 = vrot.lane.b32.xlu1 %v1618_v0, %s2850_s29 }
 0x623   : > { %1591 = vrot.lane.b32.xlu0 %v1587_v14, %s2849_s26 }
 0x625   : > { %1665 = vrot.lane.b32.xlu1 %v1587_v14, %s2847_s27 }
 0x627   : > { %1609 = vrot.lane.b32.xlu0 %v1605_v57, %s2850_s29 }
 0x629   : > { %1677 = vrot.lane.b32.xlu1 %v1605_v57, %s2848_s24 }
 0x62b   : > { %1675 = vrot.lane.b32.xlu0 %v1606_v59, %s2848_s24 }
 0x62d   : > { %1663 = vrot.lane.b32.xlu1 %v1588_v26, %s2847_s27 }
 0x62f   : > { %1687 = vrot.lane.b32.xlu0 %v1627_v27, %s2852_s15 }
 0x631   : > { %1589 = vrot.lane.b32.xlu1 %v1588_v26, %s2849_s26 }
 0x633   : > { %1630 = vrot.lane.b32.xlu0 %v1627_v27, %s2851_s30 }
 0x635   : > { %1607 = vrot.lane.b32.xlu1 %v1606_v59, %s2850_s29 }
 0x637   : > { %1689 = vrot.lane.b32.xlu0 %v1629_v29, %s2852_s15 }
 0x639   : > { %1632 = vrot.lane.b32.xlu1 %v1629_v29, %s2851_s30 }
 0x63d   : > { %1701 = vrot.lane.b32.xlu1 %v1698_v21, %s2851_s30 }
 0x679   : > { %v1583_v10 = vpop.permute.xlu0 %1582 }
 0x67b   : > { %v1573_v9 = vpop.permute.xlu1 %1572 }
 0x67c   : > { %v1638_v41 = vsel %vm1636_vm4, %v3634_v17, %v1573_v9 }
 0x67d   : > { %v1601_v16 = vpop.permute.xlu0 %1600  ;;  %v1641_v13 = vsel %vm1639_vm6, %v1638_v41, %v1583_v10 }
 0x67f   : > { %v1660_v8 = vpop.permute.xlu1 %1659 }
 0x680   : > { %v1706_v7 = vsel %vm1636_vm4, %v3639_v40, %v1660_v8 }
 0x681   : > { %v1658_v11 = vpop.permute.xlu0 %1657 }
 0x682   : > { %v1705_v39 = vsel %vm1636_vm4, %v3630_v18, %v1658_v11 }
 0x683   : > { %v1672_v5 = vpop.permute.xlu1 %1671 }
 0x685   : > { %v1670_v3 = vpop.permute.xlu0 %1669 }
 0x687   : > { %v1581_v4 = vpop.permute.xlu1 %1580 }
 0x688   : > { %v1640_v18 = vsel %vm1639_vm6, %v1637_v30, %v1581_v4 }
 0x689   : > { %v1682_v6 = vpop.permute.xlu0 %1681 }
 0x68b   : > { %v1599_v24 = vpop.permute.xlu1 %1598 }
 0x68d   : > { %v1700_v2 = vpop.permute.xlu0 %1699 }
 0x68f   : > { %v1620_v22 = vpop.permute.xlu1 %1619 }
 0x691   : > { %v1622_v36 = vpop.permute.xlu0 %1621 }
 0x693   : > { %v1684_v20 = vpop.permute.xlu1 %1683 }
 0x695   : > { %v1592_v35 = vpop.permute.xlu0 %1591 }
 0x696   : > { %v1644_v28 = vsel %vm1642_vm8, %v1641_v13, %v1592_v35 }
 0x697   : > { %v1666_v19 = vpop.permute.xlu1 %1665  ;;  %v1647_v14 = vsel %vm1645_vm9, %v1644_v28, %v1601_v16 }
 0x698   : > { %v1708_v0 = vsel %vm1639_vm6, %v1706_v7, %v1666_v19 }
 0x699   : > { %v1610_v34 = vpop.permute.xlu0 %1609  ;;  %v1710_v37 = vsel %vm1642_vm8, %v1708_v0, %v1672_v5 }
 0x69a   : > { %v1650_v59 = vsel %vm1648_vm10, %v1647_v14, %v1610_v34  ;;  %v3919_v34 = vld [vmem:[#allocation2_spill] sm:$0xff] }
 0x69b   : > { %v1678_v33 = vpop.permute.xlu1 %1677  ;;  %v1653_v61 = vsel %vm1651_vm11, %v1650_v59, %v1622_v36 }
 0x69c   : > { %v1712_v27 = vsel %vm1645_vm9, %v1710_v37, %v1678_v33 }
 0x69d   : > { %v1676_v32 = vpop.permute.xlu0 %1675  ;;  %v1714_v10 = vsel %vm1648_vm10, %v1712_v27, %v1684_v20 }
 0x69f   : > { %v1664_v62 = vpop.permute.xlu1 %1663 }
 0x6a0   : > { %v1707_v12 = vsel %vm1639_vm6, %v1705_v39, %v1664_v62 }
 0x6a1   : > { %v1709_v63 = vsel %vm1642_vm8, %v1707_v12, %v1670_v3  ;;  %v1688_v15 = vpop.permute.xlu0 %1687  ;;  %v1836_v3 = vlaneseq }
 0x6a2   : > { %v1711_v56 = vsel %vm1645_vm9, %v1709_v63, %v1676_v32 }
 0x6a3   : > { %v1713_v31 = vsel %vm1648_vm10, %v1711_v56, %v1682_v6  ;;  %v1590_v17 = vpop.permute.xlu1 %1589  ;;  %v1837_v6 = vshrl.u32 %v1836_v3, 7 }
 0x6a4   : > { %v1643_v23 = vsel %vm1642_vm8, %v1640_v18, %v1590_v17  ;;  %v1715_v52 = vsel %vm1651_vm11, %v1713_v31, %v1688_v15 }
 0x6a5   : > { %v1631_v25 = vpop.permute.xlu0 %1630  ;;  %v1646_v57 = vsel %vm1645_vm9, %v1643_v23, %v1599_v24  ;;  %v1717_v55 = vsel %vm1654_vm13, %v1715_v52, %v1700_v2 }
 0x6a6   : > { %v1721_v42 = vrot.slane %v1717_v55, 2 }
 0x6a7   : > { %v1608_v53 = vpop.permute.xlu1 %1607 }
 0x6a8   : > { %v1649_v38 = vsel %vm1648_vm10, %v1646_v57, %v1608_v53 }
 0x6a9   : > { %v1652_v26 = vsel %vm1651_vm11, %v1649_v38, %v1620_v22  ;;  %v1690_v60 = vpop.permute.xlu0 %1689  ;;  %v3724_v22 = vsub.s32 0, %v1837_v6 }
 0x6aa   : > { %v1655_v40 = vsel %vm1654_vm13, %v1652_v26, %v1631_v25  ;;  %v1716_v9 = vsel %vm1651_vm11, %v1714_v10, %v1690_v60 }
 0x6ab   : > { %2642 = vmatprep.mubr.msk.f32.mxu1 %vm1726_vm14, %v1655_v40  ;;  %v1633_v29 = vpop.permute.xlu1 %1632  ;;  %v1839_v33 = vrot.slane %v3919_v34, %v3724_v22 }
 0x6ac   : > { %v1656_v21 = vsel %vm1654_vm13, %v1653_v61, %v1633_v29 }
 0x6ad   : > { %v1725_v54 = vsel %vm1498_vm7, %v1656_v21, %v1721_v42 }
 0x6ae   : > { %2643 = vmatmul.mubr.msk.f32.vlgmr.msra.gmra.mxu1 %vm1726_vm14, %v1725_v54 }
 0x6af   : > { %v1702_v16 = vpop.permute.xlu1 %1701 }
 0x6b0   : > { %v1718_v8 = vsel %vm1654_vm13, %v1716_v9, %v1702_v16 }
 0x6b1   : > { %v1722_v11 = vrot.slane %v1718_v8, 2 }
 0x6b3   : > { %v1723_v5 = vsel %vm1498_vm7, %v1721_v42, %v1722_v11 }
 0x6b4   : > { %2645 = vmatprep.mubr.msk.f32.mxu1 %vm1726_vm14, %v1723_v5 }
 0x6b5   : > { %2646 = vmatmul.mubr.msk.f32.gmra.mxu1 %vm1726_vm14, %v1722_v11 }
 0x6b6   : > { %2654 = vmatprep.mubr.msk.f32.mxu1 %vm2844_vm5, %v2843_v58 }
 0x76e   : > { %v2644_v4 = vpop.f32.mrf.mxu1 }
 0x76f   : > { %v1826_v20 = vrot.slane %v2644_v4, 6 }
 0x770   : > { %v1803_v24 = vpop.f32.mrf.mxu1 }
 0x775   : > { %v2647_v2 = vpop.f32.mrf.mxu1 }
 0x776   : > { %v1829_v35 = vrot.slane %v2647_v2, 6 }
 0x777   : > { %v1813_v36 = vpop.f32.mrf.mxu1 }
 0x778   : > { %v1827_v19 = vrot.slane %v1813_v36, 6  ;;  %v1927_v36 = vrot.slane %v2843_v58, 6 }
 0x77a   : > { %v1828_v32 = vsel %vm1825_vm15, %v1826_v20, %v1827_v19  ;;  %v1830_v39 = vsel %vm1825_vm15, %v1827_v19, %v1829_v35 }
 0x77b   : > { %v1833_v62 = vmax.f32 %v1803_v24, %v1828_v32  ;;  %v1834_v41 = vmax.f32 %v2644_v4, %v1830_v39  ;;  %v1943_v32 = vrot.slane %v2843_v58, 7 }
 0x77d   : > { %v1841_v12 = vadd.f32 %v1839_v33, %v1833_v62  ;;  %v1842_v63 = vadd.f32 %v1839_v33, %v1834_v41 }
 0x77f   : > { %v1843_v15 = vmax.f32 %v1841_v12, 0.0  ;;  %v1844_v30 = vmax.f32 %v1842_v63, 0.0 }
 0x781   : > { %v1846_v56 = vrot.slane %v1843_v15, 4  ;;  %v1851_v18 = vsel %vm1544_vm12, 0.0, %v1844_v30 }
 0x782   : > { %v3732_v13 = vsel %vm1498_vm7, %v1851_v18, 0.0 }
 0x783   : > { %v3735_v31 = vsel %vm1693_vm3, 0.0, %v1846_v56  ;;  %v1849_v17 = vsel %vm1544_vm12, %v1846_v56, 0.0  ;;  %v1859_v28 = vrot.slane %v3732_v13, 1  ;;  %v1910_v55 = vrot.slane %v3732_v13, 5 }
 0x784   : > { %v3740_v23 = vsel %vm1613_vm2, %v1849_v17, 0.0  ;;  %v1870_v52 = vrot.slane %v3735_v31, 2  ;;  %v1922_v7 = vrot.slane %v3735_v31, 6  ;;  %v1856_v25 = vrot.slane %v3735_v31, 1 }
 0x785   : > { %v1871_v0 = vrot.slane %v3740_v23, 2  ;;  %v1923_v14 = vrot.slane %v3740_v23, 6  ;;  %v1857_v57 = vrot.slane %v3740_v23, 1  ;;  %v1907_v53 = vrot.slane %v3735_v31, 5 }
 0x786   : > { %v1908_v59 = vrot.slane %v3740_v23, 5  ;;  %v1884_v38 = vrot.slane %v3735_v31, 3  ;;  %v1885_v26 = vrot.slane %v3740_v23, 3  ;;  %v1938_v42 = vrot.slane %v3735_v31, 7 }
 0x787   : > { %v1872_v37 = vsel %vm1498_vm7, %v1870_v52, %v1871_v0  ;;  %v1924_v40 = vsel %vm1825_vm15, %v1922_v7, %v1923_v14  ;;  %v1858_v27 = vsel %vm1556_vm1, %v1856_v25, %v1857_v57  ;;  %v1860_v21 = vsel %vm1556_vm1, %v1857_v57, %v1859_v28 }
 0x788   : > { %v2775_v61 = vpack.i.bf16 %v1872_v37, %v1924_v40  ;;  %v1909_v29 = vsel %vm1906_vm0, %v1907_v53, %v1908_v59  ;;  %v1911_v54 = vsel %vm1906_vm0, %v1908_v59, %v1910_v55  ;;  %v1939_v10 = vrot.slane %v3740_v23, 7 }
 0x789   : > { %v2770_v60 = vpack.i.bf16 %v1858_v27, %v1909_v29  ;;  %v1886_v9 = vsel %vm1613_vm2, %v1884_v38, %v1885_v26  ;;  %v1887_v8 = vrot.slane %v3732_v13, 3  ;;  %v1941_v11 = vrot.slane %v3732_v13, 7 }
 0x78a   : > { %2776 = vrot.lane.b32.xlu1 %v2775_v61, %s2853_s16  ;;  %v1940_v16 = vsel %vm1544_vm12, %v1938_v42, %v1939_v10  ;;  %v2785_v5 = vpack.i.bf16 %v1860_v21, %v1911_v54  ;;  %v1873_v3 = vrot.slane %v3732_v13, 2  ;;  %v1925_v4 = vrot.slane %v3732_v13, 6 }
 0x78b   : > { %2771 = vrot.lane.b32.xlu0 %v2770_v60, %s2854_s18  ;;  %v2780_v6 = vpack.i.bf16 %v1886_v9, %v1940_v16  ;;  %v1888_v24 = vsel %vm1613_vm2, %v1885_v26, %v1887_v8  ;;  %v1942_v2 = vsel %vm1544_vm12, %v1939_v10, %v1941_v11  ;;  %v2795_v62 = vpack.i.bf16 %v1859_v28, %v1910_v55 }
 0x78c   : > { %v1874_v20 = vsel %vm1498_vm7, %v1871_v0, %v1873_v3  ;;  %v1926_v35 = vsel %vm1825_vm15, %v1923_v14, %v1925_v4  ;;  %v2800_v19 = vpack.i.bf16 %v1888_v24, %v1942_v2  ;;  %v1928_v33 = vsel %vm1825_vm15, %v1925_v4, %v1927_v36 }
 0x78d   : > { %v2790_v34 = vpack.i.bf16 %v1874_v20, %v1926_v35  ;;  %v2805_v39 = vpack.i.bf16 %v1873_v3, %v1928_v33  ;;  %v1944_v41 = vsel %vm1544_vm12, %v1941_v11, %v1943_v32  ;;  %v1898_v63 = vrot.slane %v3735_v31, 4 }
 0x78e   : > { %2786 = vrot.lane.b32.xlu1 %v2785_v5, %s2854_s18  ;;  %v2810_v12 = vpack.i.bf16 %v1887_v8, %v1944_v41  ;;  %v1899_v15 = vrot.slane %v3740_v23, 4  ;;  %vm1954_vm7 = vcmask 261120   ;;  %vm1958_vm12 = vcmask 523264  }
 0x78f   : > { %2781 = vrot.lane.b32.xlu0 %v2780_v6, %s2855_s19  ;;  %vm1962_vm1 = vcmask 785408   ;;  %vm2064_vm2 = vcmask 154624  }
 0x790   : > { %v1900_v25 = vsel %vm1693_vm3, %v1898_v63, %v1899_v15 }
 0x792   : > { %2801 = vrot.lane.b32.xlu1 %v2800_v19, %s2855_s19 }
 0x793   : > { %2791 = vrot.lane.b32.xlu0 %v2790_v34, %s2853_s16 }
 0x796   : > { %2806 = vrot.lane.b32.xlu1 %v2805_v39, %s2853_s16 }
 0x797   : > { %2796 = vrot.lane.b32.xlu0 %v2795_v62, %s2854_s18 }
 0x79b   : > { %2811 = vrot.lane.b32.xlu0 %v2810_v12, %s2855_s19 }
 0x7fc   : > { %v2777_v30 = vpop.permute.xlu1 %2776 }
 0x7fd   : > { %v2772_v56 = vpop.permute.xlu0 %2771  ;;  %v2779_v52 = vunpack.i.h.bf16 %v2777_v30  ;;  %v2778_v7 = vunpack.i.l.bf16 %v2777_v30 }
 0x7fe   : > { %v2774_v18 = vunpack.i.h.bf16 %v2772_v56  ;;  %v2773_v17 = vunpack.i.l.bf16 %v2772_v56 }
 0x800   : > { %v1955_v28 = vsel %vm1954_vm7, %v3735_v31, %v2774_v18  ;;  %v2787_v0 = vpop.permute.xlu1 %2786  ;;  %v1966_v14 = vsel %vm1954_vm7, %v1900_v25, %v2773_v17  ;;  %v1901_v31 = vrot.slane %v3732_v13, 4  ;;  %v1979_v17 = vrot.slane %v2955_v1, %v3724_v22 }
 0x801   : > { %v2782_v57 = vpop.permute.xlu0 %2781  ;;  %v2789_v55 = vunpack.i.h.bf16 %v2787_v0  ;;  %v2788_v38 = vunpack.i.l.bf16 %v2787_v0  ;;  %v1969_v26 = vsel %vm1958_vm12, %v1966_v14, %v2778_v7  ;;  %v1959_v37 = vsel %vm1958_vm12, %v1955_v28, %v2779_v52 }
 0x802   : > { %v2784_v53 = vunpack.i.h.bf16 %v2782_v57  ;;  %v2783_v59 = vunpack.i.l.bf16 %v2782_v57  ;;  %v1902_v10 = vsel %vm1693_vm3, %v1899_v15, %v1901_v31 }
 0x803   : > { %v1967_v9 = vsel %vm1954_vm7, %v1902_v10, %v2788_v38  ;;  %v1956_v16 = vsel %vm1954_vm7, %v3740_v23, %v2789_v55 }
 0x804   : > { %v2802_v40 = vpop.permute.xlu1 %2801  ;;  %v1972_v27 = vsel %vm1962_vm1, %v1969_v26, %v2783_v59  ;;  %v1963_v42 = vsel %vm1962_vm1, %v1959_v37, %v2784_v53  ;;  %v1568_v59 = vld [vmem:[%s3846_s11] sm:$0x3] }
 0x805   : > { %v2804_v61 = vunpack.i.h.bf16 %v2802_v40  ;;  %v2803_v29 = vunpack.i.l.bf16 %v2802_v40  ;;  %v2792_v60 = vpop.permute.xlu0 %2791  ;;  %2045 = vmatprep.mubr.f32.mxu0 %v1972_v27 }
 0x806   : > { %v2794_v21 = vunpack.i.h.bf16 %v2792_v60  ;;  %v2793_v54 = vunpack.i.l.bf16 %v2792_v60  ;;  %2046 = vmatmul.mubr.f32.vlgmr.msra.gmra.mxu0 %v1963_v42 }
 0x808   : > { %v2807_v8 = vpop.permute.xlu1 %2806  ;;  %v1970_v11 = vsel %vm1958_vm12, %v1967_v9, %v2793_v54  ;;  %v1960_v5 = vsel %vm1958_vm12, %v1956_v16, %v2794_v21 }
 0x809   : > { %v2797_v3 = vpop.permute.xlu0 %2796  ;;  %v1973_v4 = vsel %vm1962_vm1, %v1970_v11, %v2803_v29  ;;  %v1964_v6 = vsel %vm1962_vm1, %v1960_v5, %v2804_v61  ;;  %v2809_v36 = vunpack.i.h.bf16 %v2807_v8  ;;  %v2808_v20 = vunpack.i.l.bf16 %v2807_v8 }
 0x80a   : > { %v2799_v24 = vunpack.i.h.bf16 %v2797_v3  ;;  %v2798_v2 = vunpack.i.l.bf16 %v2797_v3  ;;  %2050 = vmatprep.mubr.f32.mxu0 %v1973_v4 }
 0x80b   : > { %2051 = vmatmul.mubr.f32.gmra.mxu0 %v1964_v6 }
 0x80c   : > { %v1968_v35 = vsel %vm1954_vm7, %v1901_v31, %v2798_v2  ;;  %v1957_v23 = vsel %vm1954_vm7, %v3732_v13, %v2799_v24 }
 0x80d   : > { %v2812_v19 = vpop.permute.xlu0 %2811  ;;  %v1971_v32 = vsel %vm1958_vm12, %v1968_v35, %v2808_v20  ;;  %v1961_v39 = vsel %vm1958_vm12, %v1957_v23, %v2809_v36 }
 0x80e   : > { %v2814_v34 = vunpack.i.h.bf16 %v2812_v19  ;;  %v2813_v33 = vunpack.i.l.bf16 %v2812_v19 }
 0x810   : > { %v1974_v62 = vsel %vm1962_vm1, %v1971_v32, %v2813_v33  ;;  %v1965_v41 = vsel %vm1962_vm1, %v1961_v39, %v2814_v34 }
 0x811   : > { %2055 = vmatprep.mubr.f32.mxu0 %v1974_v62 }
 0x812   : > { %2056 = vmatmul.mubr.f32.gmra.mxu0 %v1965_v41 }
 0x8c6   : > { %v2520_v12 = vpop.f32.mrf.mxu0 }
 0x8c8   : > { %v2521_v63 = vpop.f32.mrf.mxu0 }
 0x8c9   : > { %v2522_v52 = vadd.f32 %v2521_v63, %v2520_v12 }
 0x8cb   : > { %v2523_v15 = vpop.f32.mrf.mxu0  ;;  %v2048_v0 = vadd.f32 %v2522_v52, %v1979_v17 }
 0x8cd   : > { %v2524_v30 = vpop.f32.mrf.mxu0  ;;  %v2061_v53 = vmax.f32 %v2048_v0, 0.0 }
 0x8ce   : > { %v2525_v18 = vadd.f32 %v2524_v30, %v2523_v15 }
 0x8d0   : > { %v2053_v25 = vadd.f32 %v2525_v18, %v1979_v17 }
 0x8d2   : > { %v2526_v56 = vpop.f32.mrf.mxu0  ;;  %v2062_v57 = vmax.f32 %v2053_v25, 0.0 }
 0x8d4   : > { %v2527_v13 = vpop.f32.mrf.mxu0 }
 0x8d5   : > { %v2528_v7 = vadd.f32 %v2527_v13, %v2526_v56 }
 0x8d7   : > { %v2058_v28 = vadd.f32 %v2528_v7, %v1979_v17 }
 0x8d9   : > { %v2063_v14 = vmax.f32 %v2058_v28, 0.0 }
 0x8db   : > { %2649 = vmatpush3.msk.msra.mxu1 %vm1906_vm0, %v2063_v14 }
 0x8dc   : > { %2650 = vmatprep.subr.mxu1 %v2843_v58 }
 0x8dd   : > { %2651 = vmatpush3.msra.mxu1 %v2062_v57 }
 0x8de   : > { %2652 = vmatprep.subr.mxu1 %v2843_v58 }
 0x8df   : > { %2653 = vmatpush3.msra.mxu1 %v2061_v53 }
 0x8e0   : > { %2655 = vmatmul.mubr.msk.f32.vlgmr.msra.gmra.mxu1 %vm2064_vm2, %v1568_v59  ;;  %2657 = vmatprep.subr.mxu1 %v2843_v58 }
 0x8e1   : > { %2658 = vmatpush3.msra.mxu1 %v3109_v50  ;;  %2673 = vmatprep.mubr.msk.f32.mxu1 %vm2844_vm5, %v2843_v58  ;;  %vm2220_vm5 = vcmask 517120  }
 0x8e2   : > { %2659 = vmatprep.subr.mxu1 %v2843_v58 }
 0x8e3   : > { %2660 = vmatpush3.msra.mxu1 %v3107_v49 }
 0x8e4   : > { %2661 = vmatprep.subr.mxu1 %v2843_v58 }
 0x8e5   : > { %2662 = vmatpush3.msra.mxu1 %v3105_v48 }
 0x8e6   : > { %2663 = vmatprep.subr.mxu1 %v2843_v58 }
 0x8e7   : > { %2664 = vmatpush3.msra.mxu1 %v3103_v47 }
 0x8e8   : > { %2665 = vmatprep.subr.mxu1 %v2843_v58 }
 0x8e9   : > { %2666 = vmatpush3.msra.mxu1 %v3101_v46  ;;  %v2145_v46 = vrot.slane %v3111_v51, %v3724_v22 }
 0x8ea   : > { %2667 = vmatprep.subr.mxu1 %v2843_v58 }
 0x8eb   : > { %2668 = vmatpush3.msra.mxu1 %v3099_v45 }
 0x8ec   : > { %2669 = vmatprep.subr.mxu1 %v2843_v58 }
 0x8ed   : > { %2670 = vmatpush3.msra.mxu1 %v3097_v44 }
 0x8ee   : > { %2671 = vmatprep.subr.mxu1 %v2843_v58 }
 0x8ef   : > { %2672 = vmatpush3.msra.mxu1 %v3095_v43 }
 0x9a0   : > { %v2137_v1 = vpop.f32.mrf.mxu1 }
 0x9a1   : > { %2221 = vst.msk [vmem:[%s2978_s14] sm:$0x3] %vm2220_vm5, %v2137_v1  ;;  %2674 = vmatmul.mubr.msk.f32.vlgmr.msra.gmra.mxu1 %vm1958_vm12, %v2137_v1 }
 0x9a2   : > { %v2656_v47 = vpop.f32.mrf.mxu1 }
 0xa61   : > { %v2216_v48 = vpop.f32.mrf.mxu1 }
 0xa62   : > { %v2217_v49 = vadd.f32 %v2216_v48, %v2145_v46 }
 0xa63   : > { %v2675_v45 = vpop.f32.mrf.mxu1 }
 0xa64   : > { %2222 = vst.msk [vmem:[%s2983_s17] sm:$0x3] %vm2220_vm5, %v2217_v49 }
 0xa65 PF: > { %s24_s25 = sadd.s32 1, %s2829_s25  }
 0xa66   : > { %p21_p6 = scmp.ge.s32.totalorder %s24_s25, 4  }
 0xa68   :  { %23 = sbr.rel (!%p21_p6) target bundleno = 1 (0x1), region = 133 }

</bundles_post_ra>
